<compile_context>
chip_gen: v7x
topology: tpu7x:2x2x1
jax: 0.10.0
libtpu: 0.0.40
codegen_flags: <defaults>
</compile_context>

<pallas_src>
import functools

import jax
import jax.numpy as jnp
from jax.experimental import pallas as pl
from jax.experimental.pallas import tpu as pltpu


# Per-image left/right zero padding (in lanes) of the flattened-image scratch.
# Must be >= W + 1 and a multiple of 128 so interior stores are lane-aligned.
_PAD = 128


def _basic_block_kernel(x_ref, w1_ref, b1_ref, w2_ref, b2_ref, out_ref,
                        pad_ref, slab_ref, *, H, W, bt):
    # x_ref    : (bt, Cp, H*W)       bf16 input, channels on sublanes, flat
    #                                spatial on the lane axis (lane-dense).
    # w*_ref   : (Cp, 9*Cp)          bf16 conv weights, BN scale pre-folded,
    #                                tap-major ((kh,kw) outer, c_in inner).
    # b*_ref   : (Cp, 1)             f32 folded BN bias.
    # out_ref  : (bt, Cp, H*W)       bf16 output.
    # pad_ref  : (Cp, bt*(HW+2*_PAD)) bf16 scratch: per-image padded flat image.
    # slab_ref : (9*Cp, bt*HW)       bf16 scratch: im2col slab (both convs).
    Cp = out_ref.shape[1]
    HW = H * W
    SEG = HW + 2 * _PAD

    # Column masks, hoisted: a +/-1 horizontal shift in the flattened layout
    # wraps into the neighbouring image row; those positions must read as
    # zero padding.  Built once per grid step (JAX doesn't CSE broadcasts).
    col = jax.lax.broadcasted_iota(jnp.int32, (1, HW), 1) % W
    not_first = jnp.broadcast_to(col != 0, (Cp, HW))
    not_last = jnp.broadcast_to(col != (W - 1), (Cp, HW))
    zero_blk = jnp.zeros((Cp, HW), pad_ref.dtype)

    # Zero only the per-image pad borders (interiors are fully overwritten
    # below).  Done every step so it stays correct when the "parallel" grid
    # axis is split across TensorCores (each core has its own scratch).
    border = jnp.zeros((Cp, _PAD), pad_ref.dtype)
    for i in range(bt):
        pad_ref[:, i * SEG:i * SEG + _PAD] = border
        pad_ref[:, i * SEG + _PAD + HW:(i + 1) * SEG] = border

    def store_interiors(src):
        # src(i) -> (Cp, HW) bf16; lane-aligned interior store per image.
        for i in range(bt):
            pad_ref[:, i * SEG + _PAD:i * SEG + _PAD + HW] = src(i)

    def conv3x3(w_ref):
        # im2col: 9 shifted views per image -> (9*Cp, bt*HW) slab, then one
        # (Cp, 9*Cp) x (9*Cp, bt*HW) MXU matmul (K = 9*Cp, N = bt*HW lanes).
        t = 0
        for dh in (-1, 0, 1):
            for dw in (-1, 0, 1):
                off = _PAD + dh * W + dw
                for i in range(bt):
                    p = pad_ref[:, i * SEG + off:i * SEG + off + HW]
                    if dw == -1:
                        p = jnp.where(not_first, p, zero_blk)
                    elif dw == 1:
                        p = jnp.where(not_last, p, zero_blk)
                    slab_ref[t * Cp:(t + 1) * Cp, i * HW:(i + 1) * HW] = p
                t += 1
        return jnp.dot(w_ref[...], slab_ref[...],
                       preferred_element_type=jnp.float32)  # (Cp, bt*HW) f32

    # conv1 -> bn1 (scale folded into w1) -> relu
    store_interiors(lambda i: x_ref[i])
    y1 = jnp.maximum(conv3x3(w1_ref) + b1_ref[...], 0.0)

    # conv2 -> bn2 -> + residual -> relu
    store_interiors(lambda i: y1[:, i * HW:(i + 1) * HW].astype(pad_ref.dtype))
    y2 = conv3x3(w2_ref) + b2_ref[...]
    for i in range(bt):
        # Re-read the (VMEM-resident) input block at the residual add so the
        # loaded value is not held live across both convs.
        res = x_ref[i].astype(jnp.float32)
        out_ref[i] = jnp.maximum(y2[:, i * HW:(i + 1) * HW] + res,
                                 0.0).astype(out_ref.dtype)


def _pick_batch_tile(N, Cp, HW):
    """Images per grid step: fat steps (amortize step overhead, widen the
    matmul lane dim), but keep >= 2 steps when N allows (v7x megacore) and
    cap scratch so it fits comfortably in scoped VMEM."""
    def fits(bt):
        slab = 9 * Cp * bt * HW * 2
        pad = Cp * bt * (HW + 2 * _PAD) * 2
        io = 2 * (2 * bt * Cp * HW * 2)     # double-buffered in + out blocks
        return slab + pad + io <= 20 * 1024 * 1024
    for bt in (8, 4, 2):
        if N % bt == 0 and N // bt >= 2 and fits(bt):
            return bt
    if N <= 8 and fits(N):
        return N
    return 1


def basic_block_pallas(x_nchw, w1_hwio, w2_hwio, scale1, bias1, scale2, bias2):
    """Fused eval-mode BasicBlock forward.

    x_nchw: (N, C, H, W) f32 (PyTorch layout).  w*_hwio: (3, 3, C, C).
    scale*/bias*: folded BatchNorm per-channel scale/bias.
    Returns (N, C, H, W) bf16 (f32 accumulation inside the kernel).
    """
    N, C, H, W = x_nchw.shape
    HW = H * W
    assert W + 1 <= _PAD
    Cp = ((C + 15) // 16) * 16        # bf16 sublane tile = 16 rows

    # Fold BN scale into the conv weights (per output channel), zero-pad both
    # channel axes to Cp, reorder to (C_out, 9*C_in) tap-major.
    def fold(w, scale):
        wf = w * scale[None, None, None, :]            # (3,3,Cin,Cout)
        wf = jnp.transpose(wf, (3, 0, 1, 2))           # (Cout,3,3,Cin)
        wf = jnp.pad(wf, ((0, Cp - C), (0, 0), (0, 0), (0, Cp - C)))
        return wf.reshape(Cp, 9 * Cp).astype(jnp.bfloat16)

    w1f = fold(w1_hwio, scale1)
    w2f = fold(w2_hwio, scale2)
    b1 = jnp.pad(bias1, (0, Cp - C)).reshape(Cp, 1).astype(jnp.float32)
    b2 = jnp.pad(bias2, (0, Cp - C)).reshape(Cp, 1).astype(jnp.float32)

    # NCHW -> (N, Cp, H*W): free reshape putting H*W on the lane axis; channel
    # zero-padding keeps every sublane store tile-aligned (no-op for C%16==0).
    xf = x_nchw.reshape(N, C, HW).astype(jnp.bfloat16)
    if Cp != C:
        xf = jnp.pad(xf, ((0, 0), (0, Cp - C), (0, 0)))

    bt = _pick_batch_tile(N, Cp, HW)
    SEG = HW + 2 * _PAD

    kernel = functools.partial(_basic_block_kernel, H=H, W=W, bt=bt)
    out = pl.pallas_call(
        kernel,
        out_shape=jax.ShapeDtypeStruct((N, Cp, HW), jnp.bfloat16),
        grid=(N // bt,),
        in_specs=[
            pl.BlockSpec((bt, Cp, HW), lambda n: (n, 0, 0)),
            pl.BlockSpec((Cp, 9 * Cp), lambda n: (0, 0)),
            pl.BlockSpec((Cp, 1), lambda n: (0, 0)),
            pl.BlockSpec((Cp, 9 * Cp), lambda n: (0, 0)),
            pl.BlockSpec((Cp, 1), lambda n: (0, 0)),
        ],
        out_specs=pl.BlockSpec((bt, Cp, HW), lambda n: (n, 0, 0)),
        scratch_shapes=[
            pltpu.VMEM((Cp, bt * SEG), jnp.bfloat16),     # padded flat images
            pltpu.VMEM((9 * Cp, bt * HW), jnp.bfloat16),  # im2col slab
        ],
        compiler_params=pltpu.CompilerParams(
            dimension_semantics=("parallel",),
            vmem_limit_bytes=32 * 1024 * 1024,
        ),
    )(xf, w1f, b1, w2f, b2)

    out = out[:, :C, :].reshape(N, C, H, W)
    return out


def _reference(x_nchw, w1, w2, scale1, bias1, scale2, bias2):
    """Plain-JAX reference with the same bf16 boundary casts as the kernel."""
    dn = ('NCHW', 'HWIO', 'NCHW')
    xb = x_nchw.astype(jnp.bfloat16)
    w1f = (w1 * scale1[None, None, None, :]).astype(jnp.bfloat16)
    w2f = (w2 * scale2[None, None, None, :]).astype(jnp.bfloat16)
    out = jax.lax.conv_general_dilated(
        xb, w1f, (1, 1), [(1, 1), (1, 1)], dimension_numbers=dn,
        preferred_element_type=jnp.float32)
    out = jnp.maximum(out + bias1[None, :, None, None], 0.0)
    out = jax.lax.conv_general_dilated(
        out.astype(jnp.bfloat16), w2f, (1, 1), [(1, 1), (1, 1)],
        dimension_numbers=dn, preferred_element_type=jnp.float32)
    out = out + bias2[None, :, None, None]
    return jnp.maximum(out + xb.astype(jnp.float32), 0.0)


if __name__ == "__main__":
    # BasicBlock(conv_builder=nn.Conv2d, inplanes=4, planes=4, stride=1,
    #            downsample=None), eval mode.
    N, C, H, W = 2, 4, 16, 16
    eps = 1e-5

    key = jax.random.PRNGKey(0)
    keys = jax.random.split(key, 11)

    # PyTorch-style NCHW input.
    x_nchw = jax.random.normal(keys[0], (N, C, H, W), jnp.float32)

    # Conv weights built directly in HWIO.
    w1 = jax.random.normal(keys[1], (3, 3, C, C), jnp.float32) * 0.2
    w2 = jax.random.normal(keys[2], (3, 3, C, C), jnp.float32) * 0.2

    # Deterministic eval-mode BN parameters.
    gamma1 = 1.0 + 0.1 * jax.random.normal(keys[3], (C,), jnp.float32)
    beta1 = 0.1 * jax.random.normal(keys[4], (C,), jnp.float32)
    mean1 = 0.1 * jax.random.normal(keys[5], (C,), jnp.float32)
    var1 = 1.0 + 0.1 * jax.random.uniform(keys[6], (C,), jnp.float32)
    gamma2 = 1.0 + 0.1 * jax.random.normal(keys[7], (C,), jnp.float32)
    beta2 = 0.1 * jax.random.normal(keys[8], (C,), jnp.float32)
    mean2 = 0.1 * jax.random.normal(keys[9], (C,), jnp.float32)
    var2 = 1.0 + 0.1 * jax.random.uniform(keys[10], (C,), jnp.float32)

    # Fold BN into per-channel scale/bias: y = x*scale + bias.
    scale1 = gamma1 / jnp.sqrt(var1 + eps)
    bias1 = beta1 - mean1 * scale1
    scale2 = gamma2 / jnp.sqrt(var2 + eps)
    bias2 = beta2 - mean2 * scale2

    out = basic_block_pallas(x_nchw, w1, w2, scale1, bias1, scale2, bias2)
    out = jax.block_until_ready(out)
    assert out.shape == (N, C, H, W)
    assert out.dtype == jnp.bfloat16

    ref = _reference(x_nchw, w1, w2, scale1, bias1, scale2, bias2)
    out_f32 = out.astype(jnp.float32)
    max_err = jnp.max(jnp.abs(out_f32 - ref))
    assert jnp.allclose(out_f32, ref, atol=1e-2, rtol=1e-2), (
        f"mismatch vs reference (max abs err {max_err})")

    print("KERNEL_OK")
</pallas_src>

<mosaic_0001>
module attributes {stable_mosaic.version = 11 : i64} {
  func.func @_basic_block_kernel(%arg0: i32, %arg1: memref<2x16x256xbf16, #tpu.memory_space<vmem>>, %arg2: memref<16x144xbf16, #tpu.memory_space<vmem>>, %arg3: memref<16x1xf32, #tpu.memory_space<vmem>>, %arg4: memref<16x144xbf16, #tpu.memory_space<vmem>>, %arg5: memref<16x1xf32, #tpu.memory_space<vmem>>, %arg6: memref<2x16x256xbf16, #tpu.memory_space<vmem>>, %arg7: memref<16x1024xbf16, #tpu.memory_space<vmem>>, %arg8: memref<144x512xbf16, #tpu.memory_space<vmem>>) attributes {dimension_semantics = [#tpu.dimension_semantics<parallel>], iteration_bounds = array<i64: 1>, scalar_prefetch = 0 : i64, scratch_operands = 2 : i64, tpu.core_type = #tpu.core_type<tc>, window_params = [{transform_indices = @transform_0, window_bounds = array<i64: 2, 16, 256>}, {pipeline_mode = #tpu.pipeline_mode<synchronous>, transform_indices = @transform_1, window_bounds = array<i64: 16, 144>}, {pipeline_mode = #tpu.pipeline_mode<synchronous>, transform_indices = @transform_2, window_bounds = array<i64: 16, 1>}, {pipeline_mode = #tpu.pipeline_mode<synchronous>, transform_indices = @transform_3, window_bounds = array<i64: 16, 144>}, {pipeline_mode = #tpu.pipeline_mode<synchronous>, transform_indices = @transform_4, window_bounds = array<i64: 16, 1>}, {transform_indices = @transform_5, window_bounds = array<i64: 2, 16, 256>}]} {
    %0 = tpu.iota {dimensions = array<i32: 1>} : vector<1x256xi32>
    %c16_i32 = arith.constant 16 : i32
    %c0_i32 = arith.constant 0 : i32
    %1 = arith.cmpi eq, %c16_i32, %c0_i32 : i32
    %c1_i32 = arith.constant 1 : i32
    %2 = arith.select %1, %c1_i32, %c16_i32 : i32
    %3 = vector.broadcast %2 : i32 to vector<1x256xi32>
    %4 = arith.remsi %0, %3 : vector<1x256xi32>
    %c0_i32_0 = arith.constant 0 : i32
    %5 = vector.broadcast %c0_i32_0 : i32 to vector<1x256xi32>
    %6 = arith.cmpi ne, %4, %5 : vector<1x256xi32>
    %c0_i32_1 = arith.constant 0 : i32
    %7 = vector.broadcast %c0_i32_1 : i32 to vector<1x256xi32>
    %8 = arith.cmpi slt, %4, %7 : vector<1x256xi32>
    %c0_i32_2 = arith.constant 0 : i32
    %9 = arith.cmpi slt, %2, %c0_i32_2 : i32
    %10 = vector.broadcast %9 : i1 to vector<1x256xi1>
    %11 = vector.broadcast %10 : vector<1x256xi1> to vector<1x256xi1>
    %12 = arith.xori %8, %11 : vector<1x256xi1>
    %13 = arith.andi %12, %6 : vector<1x256xi1>
    %14 = vector.broadcast %2 : i32 to vector<1x256xi32>
    %15 = arith.addi %4, %14 : vector<1x256xi32>
    %16 = arith.select %13, %15, %4 : vector<1x256xi1>, vector<1x256xi32>
    %c0_i32_3 = arith.constant 0 : i32
    %17 = vector.broadcast %c0_i32_3 : i32 to vector<1x256xi32>
    %18 = arith.cmpi ne, %16, %17 : vector<1x256xi32>
    %19 = vector.shape_cast %18 : vector<1x256xi1> to vector<1x256xi1>
    %20 = vector.broadcast %19 : vector<1x256xi1> to vector<16x256xi1>
    %c15_i32 = arith.constant 15 : i32
    %21 = vector.broadcast %c15_i32 : i32 to vector<1x256xi32>
    %22 = arith.cmpi ne, %16, %21 : vector<1x256xi32>
    %23 = vector.shape_cast %22 : vector<1x256xi1> to vector<1x256xi1>
    %24 = vector.broadcast %23 : vector<1x256xi1> to vector<16x256xi1>
    %cst = arith.constant 0.000000e+00 : bf16
    %25 = vector.broadcast %cst : bf16 to vector<16x256xbf16>
    %cst_4 = arith.constant 0.000000e+00 : bf16
    %26 = vector.broadcast %cst_4 : bf16 to vector<16x128xbf16>
    %c0 = arith.constant 0 : index
    %c0_5 = arith.constant 0 : index
    %27 = vector.load %arg7[%c0, %c0_5] : memref<16x1024xbf16, #tpu.memory_space<vmem>>, vector<16x128xbf16>
    tpu.vector_store %arg7[%c0, %c0_5], %26 {strides = array<i32>} : memref<16x1024xbf16, #tpu.memory_space<vmem>>, vector<16x128xbf16>,
    %c0_6 = arith.constant 0 : index
    %c384 = arith.constant 384 : index
    %28 = vector.load %arg7[%c0_6, %c384] : memref<16x1024xbf16, #tpu.memory_space<vmem>>, vector<16x128xbf16>
    tpu.vector_store %arg7[%c0_6, %c384], %26 {strides = array<i32>} : memref<16x1024xbf16, #tpu.memory_space<vmem>>, vector<16x128xbf16>,
    %c0_7 = arith.constant 0 : index
    %c512 = arith.constant 512 : index
    %29 = vector.load %arg7[%c0_7, %c512] : memref<16x1024xbf16, #tpu.memory_space<vmem>>, vector<16x128xbf16>
    tpu.vector_store %arg7[%c0_7, %c512], %26 {strides = array<i32>} : memref<16x1024xbf16, #tpu.memory_space<vmem>>, vector<16x128xbf16>,
    %c0_8 = arith.constant 0 : index
    %c896 = arith.constant 896 : index
    %30 = vector.load %arg7[%c0_8, %c896] : memref<16x1024xbf16, #tpu.memory_space<vmem>>, vector<16x128xbf16>
    tpu.vector_store %arg7[%c0_8, %c896], %26 {strides = array<i32>} : memref<16x1024xbf16, #tpu.memory_space<vmem>>, vector<16x128xbf16>,
    %c0_9 = arith.constant 0 : index
    %c0_10 = arith.constant 0 : index
    %c0_11 = arith.constant 0 : index
    %31 = vector.load %arg1[%c0_9, %c0_10, %c0_11] : memref<2x16x256xbf16, #tpu.memory_space<vmem>>, vector<1x16x256xbf16>
    %32 = vector.shape_cast %31 : vector<1x16x256xbf16> to vector<16x256xbf16>
    %c0_12 = arith.constant 0 : index
    %c128 = arith.constant 128 : index
    %33 = vector.load %arg7[%c0_12, %c128] : memref<16x1024xbf16, #tpu.memory_space<vmem>>, vector<16x256xbf16>
    tpu.vector_store %arg7[%c0_12, %c128], %32 {strides = array<i32>} : memref<16x1024xbf16, #tpu.memory_space<vmem>>, vector<16x256xbf16>,
    %c1 = arith.constant 1 : index
    %c0_13 = arith.constant 0 : index
    %c0_14 = arith.constant 0 : index
    %34 = vector.load %arg1[%c1, %c0_13, %c0_14] : memref<2x16x256xbf16, #tpu.memory_space<vmem>>, vector<1x16x256xbf16>
    %35 = vector.shape_cast %34 : vector<1x16x256xbf16> to vector<16x256xbf16>
    %c0_15 = arith.constant 0 : index
    %c640 = arith.constant 640 : index
    %36 = vector.load %arg7[%c0_15, %c640] : memref<16x1024xbf16, #tpu.memory_space<vmem>>, vector<16x256xbf16>
    tpu.vector_store %arg7[%c0_15, %c640], %35 {strides = array<i32>} : memref<16x1024xbf16, #tpu.memory_space<vmem>>, vector<16x256xbf16>,
    %c0_16 = arith.constant 0 : index
    %c111 = arith.constant 111 : index
    %37 = vector.load %arg7[%c0_16, %c111] : memref<16x1024xbf16, #tpu.memory_space<vmem>>, vector<16x256xbf16>
    %38 = arith.select %20, %37, %25 : vector<16x256xi1>, vector<16x256xbf16>
    %c0_17 = arith.constant 0 : index
    %c0_18 = arith.constant 0 : index
    %39 = vector.load %arg8[%c0_17, %c0_18] : memref<144x512xbf16, #tpu.memory_space<vmem>>, vector<16x256xbf16>
    tpu.vector_store %arg8[%c0_17, %c0_18], %38 {strides = array<i32>} : memref<144x512xbf16, #tpu.memory_space<vmem>>, vector<16x256xbf16>,
    %c0_19 = arith.constant 0 : index
    %c623 = arith.constant 623 : index
    %40 = vector.load %arg7[%c0_19, %c623] : memref<16x1024xbf16, #tpu.memory_space<vmem>>, vector<16x256xbf16>
    %41 = arith.select %20, %40, %25 : vector<16x256xi1>, vector<16x256xbf16>
    %c0_20 = arith.constant 0 : index
    %c256 = arith.constant 256 : index
    %42 = vector.load %arg8[%c0_20, %c256] : memref<144x512xbf16, #tpu.memory_space<vmem>>, vector<16x256xbf16>
    tpu.vector_store %arg8[%c0_20, %c256], %41 {strides = array<i32>} : memref<144x512xbf16, #tpu.memory_space<vmem>>, vector<16x256xbf16>,
    %c0_21 = arith.constant 0 : index
    %c112 = arith.constant 112 : index
    %43 = vector.load %arg7[%c0_21, %c112] : memref<16x1024xbf16, #tpu.memory_space<vmem>>, vector<16x256xbf16>
    %c16 = arith.constant 16 : index
    %c0_22 = arith.constant 0 : index
    %44 = vector.load %arg8[%c16, %c0_22] : memref<144x512xbf16, #tpu.memory_space<vmem>>, vector<16x256xbf16>
    tpu.vector_store %arg8[%c16, %c0_22], %43 {strides = array<i32>} : memref<144x512xbf16, #tpu.memory_space<vmem>>, vector<16x256xbf16>,
    %c0_23 = arith.constant 0 : index
    %c624 = arith.constant 624 : index
    %45 = vector.load %arg7[%c0_23, %c624] : memref<16x1024xbf16, #tpu.memory_space<vmem>>, vector<16x256xbf16>
    %c16_24 = arith.constant 16 : index
    %c256_25 = arith.constant 256 : index
    %46 = vector.load %arg8[%c16_24, %c256_25] : memref<144x512xbf16, #tpu.memory_space<vmem>>, vector<16x256xbf16>
    tpu.vector_store %arg8[%c16_24, %c256_25], %45 {strides = array<i32>} : memref<144x512xbf16, #tpu.memory_space<vmem>>, vector<16x256xbf16>,
    %c0_26 = arith.constant 0 : index
    %c113 = arith.constant 113 : index
    %47 = vector.load %arg7[%c0_26, %c113] : memref<16x1024xbf16, #tpu.memory_space<vmem>>, vector<16x256xbf16>
    %48 = arith.select %24, %47, %25 : vector<16x256xi1>, vector<16x256xbf16>
    %c32 = arith.constant 32 : index
    %c0_27 = arith.constant 0 : index
    %49 = vector.load %arg8[%c32, %c0_27] : memref<144x512xbf16, #tpu.memory_space<vmem>>, vector<16x256xbf16>
    tpu.vector_store %arg8[%c32, %c0_27], %48 {strides = array<i32>} : memref<144x512xbf16, #tpu.memory_space<vmem>>, vector<16x256xbf16>,
    %c0_28 = arith.constant 0 : index
    %c625 = arith.constant 625 : index
    %50 = vector.load %arg7[%c0_28, %c625] : memref<16x1024xbf16, #tpu.memory_space<vmem>>, vector<16x256xbf16>
    %51 = arith.select %24, %50, %25 : vector<16x256xi1>, vector<16x256xbf16>
    %c32_29 = arith.constant 32 : index
    %c256_30 = arith.constant 256 : index
    %52 = vector.load %arg8[%c32_29, %c256_30] : memref<144x512xbf16, #tpu.memory_space<vmem>>, vector<16x256xbf16>
    tpu.vector_store %arg8[%c32_29, %c256_30], %51 {strides = array<i32>} : memref<144x512xbf16, #tpu.memory_space<vmem>>, vector<16x256xbf16>,
    %c0_31 = arith.constant 0 : index
    %c127 = arith.constant 127 : index
    %53 = vector.load %arg7[%c0_31, %c127] : memref<16x1024xbf16, #tpu.memory_space<vmem>>, vector<16x256xbf16>
    %54 = arith.select %20, %53, %25 : vector<16x256xi1>, vector<16x256xbf16>
    %c48 = arith.constant 48 : index
    %c0_32 = arith.constant 0 : index
    %55 = vector.load %arg8[%c48, %c0_32] : memref<144x512xbf16, #tpu.memory_space<vmem>>, vector<16x256xbf16>
    tpu.vector_store %arg8[%c48, %c0_32], %54 {strides = array<i32>} : memref<144x512xbf16, #tpu.memory_space<vmem>>, vector<16x256xbf16>,
    %c0_33 = arith.constant 0 : index
    %c639 = arith.constant 639 : index
    %56 = vector.load %arg7[%c0_33, %c639] : memref<16x1024xbf16, #tpu.memory_space<vmem>>, vector<16x256xbf16>
    %57 = arith.select %20, %56, %25 : vector<16x256xi1>, vector<16x256xbf16>
    %c48_34 = arith.constant 48 : index
    %c256_35 = arith.constant 256 : index
    %58 = vector.load %arg8[%c48_34, %c256_35] : memref<144x512xbf16, #tpu.memory_space<vmem>>, vector<16x256xbf16>
    tpu.vector_store %arg8[%c48_34, %c256_35], %57 {strides = array<i32>} : memref<144x512xbf16, #tpu.memory_space<vmem>>, vector<16x256xbf16>,
    %c0_36 = arith.constant 0 : index
    %c128_37 = arith.constant 128 : index
    %59 = vector.load %arg7[%c0_36, %c128_37] : memref<16x1024xbf16, #tpu.memory_space<vmem>>, vector<16x256xbf16>
    %c64 = arith.constant 64 : index
    %c0_38 = arith.constant 0 : index
    %60 = vector.load %arg8[%c64, %c0_38] : memref<144x512xbf16, #tpu.memory_space<vmem>>, vector<16x256xbf16>
    tpu.vector_store %arg8[%c64, %c0_38], %59 {strides = array<i32>} : memref<144x512xbf16, #tpu.memory_space<vmem>>, vector<16x256xbf16>,
    %c0_39 = arith.constant 0 : index
    %c640_40 = arith.constant 640 : index
    %61 = vector.load %arg7[%c0_39, %c640_40] : memref<16x1024xbf16, #tpu.memory_space<vmem>>, vector<16x256xbf16>
    %c64_41 = arith.constant 64 : index
    %c256_42 = arith.constant 256 : index
    %62 = vector.load %arg8[%c64_41, %c256_42] : memref<144x512xbf16, #tpu.memory_space<vmem>>, vector<16x256xbf16>
    tpu.vector_store %arg8[%c64_41, %c256_42], %61 {strides = array<i32>} : memref<144x512xbf16, #tpu.memory_space<vmem>>, vector<16x256xbf16>,
    %c0_43 = arith.constant 0 : index
    %c129 = arith.constant 129 : index
    %63 = vector.load %arg7[%c0_43, %c129] : memref<16x1024xbf16, #tpu.memory_space<vmem>>, vector<16x256xbf16>
    %64 = arith.select %24, %63, %25 : vector<16x256xi1>, vector<16x256xbf16>
    %c80 = arith.constant 80 : index
    %c0_44 = arith.constant 0 : index
    %65 = vector.load %arg8[%c80, %c0_44] : memref<144x512xbf16, #tpu.memory_space<vmem>>, vector<16x256xbf16>
    tpu.vector_store %arg8[%c80, %c0_44], %64 {strides = array<i32>} : memref<144x512xbf16, #tpu.memory_space<vmem>>, vector<16x256xbf16>,
    %c0_45 = arith.constant 0 : index
    %c641 = arith.constant 641 : index
    %66 = vector.load %arg7[%c0_45, %c641] : memref<16x1024xbf16, #tpu.memory_space<vmem>>, vector<16x256xbf16>
    %67 = arith.select %24, %66, %25 : vector<16x256xi1>, vector<16x256xbf16>
    %c80_46 = arith.constant 80 : index
    %c256_47 = arith.constant 256 : index
    %68 = vector.load %arg8[%c80_46, %c256_47] : memref<144x512xbf16, #tpu.memory_space<vmem>>, vector<16x256xbf16>
    tpu.vector_store %arg8[%c80_46, %c256_47], %67 {strides = array<i32>} : memref<144x512xbf16, #tpu.memory_space<vmem>>, vector<16x256xbf16>,
    %c0_48 = arith.constant 0 : index
    %c143 = arith.constant 143 : index
    %69 = vector.load %arg7[%c0_48, %c143] : memref<16x1024xbf16, #tpu.memory_space<vmem>>, vector<16x256xbf16>
    %70 = arith.select %20, %69, %25 : vector<16x256xi1>, vector<16x256xbf16>
    %c96 = arith.constant 96 : index
    %c0_49 = arith.constant 0 : index
    %71 = vector.load %arg8[%c96, %c0_49] : memref<144x512xbf16, #tpu.memory_space<vmem>>, vector<16x256xbf16>
    tpu.vector_store %arg8[%c96, %c0_49], %70 {strides = array<i32>} : memref<144x512xbf16, #tpu.memory_space<vmem>>, vector<16x256xbf16>,
    %c0_50 = arith.constant 0 : index
    %c655 = arith.constant 655 : index
    %72 = vector.load %arg7[%c0_50, %c655] : memref<16x1024xbf16, #tpu.memory_space<vmem>>, vector<16x256xbf16>
    %73 = arith.select %20, %72, %25 : vector<16x256xi1>, vector<16x256xbf16>
    %c96_51 = arith.constant 96 : index
    %c256_52 = arith.constant 256 : index
    %74 = vector.load %arg8[%c96_51, %c256_52] : memref<144x512xbf16, #tpu.memory_space<vmem>>, vector<16x256xbf16>
    tpu.vector_store %arg8[%c96_51, %c256_52], %73 {strides = array<i32>} : memref<144x512xbf16, #tpu.memory_space<vmem>>, vector<16x256xbf16>,
    %c0_53 = arith.constant 0 : index
    %c144 = arith.constant 144 : index
    %75 = vector.load %arg7[%c0_53, %c144] : memref<16x1024xbf16, #tpu.memory_space<vmem>>, vector<16x256xbf16>
    %c112_54 = arith.constant 112 : index
    %c0_55 = arith.constant 0 : index
    %76 = vector.load %arg8[%c112_54, %c0_55] : memref<144x512xbf16, #tpu.memory_space<vmem>>, vector<16x256xbf16>
    tpu.vector_store %arg8[%c112_54, %c0_55], %75 {strides = array<i32>} : memref<144x512xbf16, #tpu.memory_space<vmem>>, vector<16x256xbf16>,
    %c0_56 = arith.constant 0 : index
    %c656 = arith.constant 656 : index
    %77 = vector.load %arg7[%c0_56, %c656] : memref<16x1024xbf16, #tpu.memory_space<vmem>>, vector<16x256xbf16>
    %c112_57 = arith.constant 112 : index
    %c256_58 = arith.constant 256 : index
    %78 = vector.load %arg8[%c112_57, %c256_58] : memref<144x512xbf16, #tpu.memory_space<vmem>>, vector<16x256xbf16>
    tpu.vector_store %arg8[%c112_57, %c256_58], %77 {strides = array<i32>} : memref<144x512xbf16, #tpu.memory_space<vmem>>, vector<16x256xbf16>,
    %c0_59 = arith.constant 0 : index
    %c145 = arith.constant 145 : index
    %79 = vector.load %arg7[%c0_59, %c145] : memref<16x1024xbf16, #tpu.memory_space<vmem>>, vector<16x256xbf16>
    %80 = arith.select %24, %79, %25 : vector<16x256xi1>, vector<16x256xbf16>
    %c128_60 = arith.constant 128 : index
    %c0_61 = arith.constant 0 : index
    %81 = vector.load %arg8[%c128_60, %c0_61] : memref<144x512xbf16, #tpu.memory_space<vmem>>, vector<16x256xbf16>
    tpu.vector_store %arg8[%c128_60, %c0_61], %80 {strides = array<i32>} : memref<144x512xbf16, #tpu.memory_space<vmem>>, vector<16x256xbf16>,
    %c0_62 = arith.constant 0 : index
    %c657 = arith.constant 657 : index
    %82 = vector.load %arg7[%c0_62, %c657] : memref<16x1024xbf16, #tpu.memory_space<vmem>>, vector<16x256xbf16>
    %83 = arith.select %24, %82, %25 : vector<16x256xi1>, vector<16x256xbf16>
    %c128_63 = arith.constant 128 : index
    %c256_64 = arith.constant 256 : index
    %84 = vector.load %arg8[%c128_63, %c256_64] : memref<144x512xbf16, #tpu.memory_space<vmem>>, vector<16x256xbf16>
    tpu.vector_store %arg8[%c128_63, %c256_64], %83 {strides = array<i32>} : memref<144x512xbf16, #tpu.memory_space<vmem>>, vector<16x256xbf16>,
    %c0_65 = arith.constant 0 : index
    %c0_66 = arith.constant 0 : index
    %85 = vector.load %arg2[%c0_65, %c0_66] : memref<16x144xbf16, #tpu.memory_space<vmem>>, vector<16x144xbf16>
    %c0_67 = arith.constant 0 : index
    %c0_68 = arith.constant 0 : index
    %86 = vector.load %arg8[%c0_67, %c0_68] : memref<144x512xbf16, #tpu.memory_space<vmem>>, vector<144x512xbf16>
    %cst_69 = arith.constant dense<0.000000e+00> : vector<16x512xf32>
    %87 = tpu.matmul %85, %86, %cst_69 {dimension_numbers = #tpu.dot_dimension_numbers<[1], [0], [0], [1], [0, 0, 1, 1], [], []>} : vector<16x144xbf16>, vector<144x512xbf16>, vector<16x512xf32> -> vector<16x512xf32>
    %c0_70 = arith.constant 0 : index
    %c0_71 = arith.constant 0 : index
    %88 = vector.load %arg3[%c0_70, %c0_71] : memref<16x1xf32, #tpu.memory_space<vmem>>, vector<16x1xf32>
    %89 = vector.broadcast %88 : vector<16x1xf32> to vector<16x512xf32>
    %90 = arith.addf %87, %89 : vector<16x512xf32>
    %cst_72 = arith.constant 0.000000e+00 : f32
    %91 = vector.broadcast %cst_72 : f32 to vector<16x512xf32>
    %92 = arith.maximumf %90, %91 : vector<16x512xf32>
    %93 = vector.extract_strided_slice %92 {offsets = [0, 0], sizes = [16, 256], strides = [1, 1]} : vector<16x512xf32> to vector<16x256xf32>
    %94 = arith.truncf %93 : vector<16x256xf32> to vector<16x256xbf16>
    %c0_73 = arith.constant 0 : index
    %c128_74 = arith.constant 128 : index
    %95 = vector.load %arg7[%c0_73, %c128_74] : memref<16x1024xbf16, #tpu.memory_space<vmem>>, vector<16x256xbf16>
    tpu.vector_store %arg7[%c0_73, %c128_74], %94 {strides = array<i32>} : memref<16x1024xbf16, #tpu.memory_space<vmem>>, vector<16x256xbf16>,
    %96 = vector.extract_strided_slice %92 {offsets = [0, 256], sizes = [16, 256], strides = [1, 1]} : vector<16x512xf32> to vector<16x256xf32>
    %97 = arith.truncf %96 : vector<16x256xf32> to vector<16x256xbf16>
    %c0_75 = arith.constant 0 : index
    %c640_76 = arith.constant 640 : index
    %98 = vector.load %arg7[%c0_75, %c640_76] : memref<16x1024xbf16, #tpu.memory_space<vmem>>, vector<16x256xbf16>
    tpu.vector_store %arg7[%c0_75, %c640_76], %97 {strides = array<i32>} : memref<16x1024xbf16, #tpu.memory_space<vmem>>, vector<16x256xbf16>,
    %c0_77 = arith.constant 0 : index
    %c111_78 = arith.constant 111 : index
    %99 = vector.load %arg7[%c0_77, %c111_78] : memref<16x1024xbf16, #tpu.memory_space<vmem>>, vector<16x256xbf16>
    %100 = arith.select %20, %99, %25 : vector<16x256xi1>, vector<16x256xbf16>
    %c0_79 = arith.constant 0 : index
    %c0_80 = arith.constant 0 : index
    %101 = vector.load %arg8[%c0_79, %c0_80] : memref<144x512xbf16, #tpu.memory_space<vmem>>, vector<16x256xbf16>
    tpu.vector_store %arg8[%c0_79, %c0_80], %100 {strides = array<i32>} : memref<144x512xbf16, #tpu.memory_space<vmem>>, vector<16x256xbf16>,
    %c0_81 = arith.constant 0 : index
    %c623_82 = arith.constant 623 : index
    %102 = vector.load %arg7[%c0_81, %c623_82] : memref<16x1024xbf16, #tpu.memory_space<vmem>>, vector<16x256xbf16>
    %103 = arith.select %20, %102, %25 : vector<16x256xi1>, vector<16x256xbf16>
    %c0_83 = arith.constant 0 : index
    %c256_84 = arith.constant 256 : index
    %104 = vector.load %arg8[%c0_83, %c256_84] : memref<144x512xbf16, #tpu.memory_space<vmem>>, vector<16x256xbf16>
    tpu.vector_store %arg8[%c0_83, %c256_84], %103 {strides = array<i32>} : memref<144x512xbf16, #tpu.memory_space<vmem>>, vector<16x256xbf16>,
    %c0_85 = arith.constant 0 : index
    %c112_86 = arith.constant 112 : index
    %105 = vector.load %arg7[%c0_85, %c112_86] : memref<16x1024xbf16, #tpu.memory_space<vmem>>, vector<16x256xbf16>
    %c16_87 = arith.constant 16 : index
    %c0_88 = arith.constant 0 : index
    %106 = vector.load %arg8[%c16_87, %c0_88] : memref<144x512xbf16, #tpu.memory_space<vmem>>, vector<16x256xbf16>
    tpu.vector_store %arg8[%c16_87, %c0_88], %105 {strides = array<i32>} : memref<144x512xbf16, #tpu.memory_space<vmem>>, vector<16x256xbf16>,
    %c0_89 = arith.constant 0 : index
    %c624_90 = arith.constant 624 : index
    %107 = vector.load %arg7[%c0_89, %c624_90] : memref<16x1024xbf16, #tpu.memory_space<vmem>>, vector<16x256xbf16>
    %c16_91 = arith.constant 16 : index
    %c256_92 = arith.constant 256 : index
    %108 = vector.load %arg8[%c16_91, %c256_92] : memref<144x512xbf16, #tpu.memory_space<vmem>>, vector<16x256xbf16>
    tpu.vector_store %arg8[%c16_91, %c256_92], %107 {strides = array<i32>} : memref<144x512xbf16, #tpu.memory_space<vmem>>, vector<16x256xbf16>,
    %c0_93 = arith.constant 0 : index
    %c113_94 = arith.constant 113 : index
    %109 = vector.load %arg7[%c0_93, %c113_94] : memref<16x1024xbf16, #tpu.memory_space<vmem>>, vector<16x256xbf16>
    %110 = arith.select %24, %109, %25 : vector<16x256xi1>, vector<16x256xbf16>
    %c32_95 = arith.constant 32 : index
    %c0_96 = arith.constant 0 : index
    %111 = vector.load %arg8[%c32_95, %c0_96] : memref<144x512xbf16, #tpu.memory_space<vmem>>, vector<16x256xbf16>
    tpu.vector_store %arg8[%c32_95, %c0_96], %110 {strides = array<i32>} : memref<144x512xbf16, #tpu.memory_space<vmem>>, vector<16x256xbf16>,
    %c0_97 = arith.constant 0 : index
    %c625_98 = arith.constant 625 : index
    %112 = vector.load %arg7[%c0_97, %c625_98] : memref<16x1024xbf16, #tpu.memory_space<vmem>>, vector<16x256xbf16>
    %113 = arith.select %24, %112, %25 : vector<16x256xi1>, vector<16x256xbf16>
    %c32_99 = arith.constant 32 : index
    %c256_100 = arith.constant 256 : index
    %114 = vector.load %arg8[%c32_99, %c256_100] : memref<144x512xbf16, #tpu.memory_space<vmem>>, vector<16x256xbf16>
    tpu.vector_store %arg8[%c32_99, %c256_100], %113 {strides = array<i32>} : memref<144x512xbf16, #tpu.memory_space<vmem>>, vector<16x256xbf16>,
    %c0_101 = arith.constant 0 : index
    %c127_102 = arith.constant 127 : index
    %115 = vector.load %arg7[%c0_101, %c127_102] : memref<16x1024xbf16, #tpu.memory_space<vmem>>, vector<16x256xbf16>
    %116 = arith.select %20, %115, %25 : vector<16x256xi1>, vector<16x256xbf16>
    %c48_103 = arith.constant 48 : index
    %c0_104 = arith.constant 0 : index
    %117 = vector.load %arg8[%c48_103, %c0_104] : memref<144x512xbf16, #tpu.memory_space<vmem>>, vector<16x256xbf16>
    tpu.vector_store %arg8[%c48_103, %c0_104], %116 {strides = array<i32>} : memref<144x512xbf16, #tpu.memory_space<vmem>>, vector<16x256xbf16>,
    %c0_105 = arith.constant 0 : index
    %c639_106 = arith.constant 639 : index
    %118 = vector.load %arg7[%c0_105, %c639_106] : memref<16x1024xbf16, #tpu.memory_space<vmem>>, vector<16x256xbf16>
    %119 = arith.select %20, %118, %25 : vector<16x256xi1>, vector<16x256xbf16>
    %c48_107 = arith.constant 48 : index
    %c256_108 = arith.constant 256 : index
    %120 = vector.load %arg8[%c48_107, %c256_108] : memref<144x512xbf16, #tpu.memory_space<vmem>>, vector<16x256xbf16>
    tpu.vector_store %arg8[%c48_107, %c256_108], %119 {strides = array<i32>} : memref<144x512xbf16, #tpu.memory_space<vmem>>, vector<16x256xbf16>,
    %c0_109 = arith.constant 0 : index
    %c128_110 = arith.constant 128 : index
    %121 = vector.load %arg7[%c0_109, %c128_110] : memref<16x1024xbf16, #tpu.memory_space<vmem>>, vector<16x256xbf16>
    %c64_111 = arith.constant 64 : index
    %c0_112 = arith.constant 0 : index
    %122 = vector.load %arg8[%c64_111, %c0_112] : memref<144x512xbf16, #tpu.memory_space<vmem>>, vector<16x256xbf16>
    tpu.vector_store %arg8[%c64_111, %c0_112], %121 {strides = array<i32>} : memref<144x512xbf16, #tpu.memory_space<vmem>>, vector<16x256xbf16>,
    %c0_113 = arith.constant 0 : index
    %c640_114 = arith.constant 640 : index
    %123 = vector.load %arg7[%c0_113, %c640_114] : memref<16x1024xbf16, #tpu.memory_space<vmem>>, vector<16x256xbf16>
    %c64_115 = arith.constant 64 : index
    %c256_116 = arith.constant 256 : index
    %124 = vector.load %arg8[%c64_115, %c256_116] : memref<144x512xbf16, #tpu.memory_space<vmem>>, vector<16x256xbf16>
    tpu.vector_store %arg8[%c64_115, %c256_116], %123 {strides = array<i32>} : memref<144x512xbf16, #tpu.memory_space<vmem>>, vector<16x256xbf16>,
    %c0_117 = arith.constant 0 : index
    %c129_118 = arith.constant 129 : index
    %125 = vector.load %arg7[%c0_117, %c129_118] : memref<16x1024xbf16, #tpu.memory_space<vmem>>, vector<16x256xbf16>
    %126 = arith.select %24, %125, %25 : vector<16x256xi1>, vector<16x256xbf16>
    %c80_119 = arith.constant 80 : index
    %c0_120 = arith.constant 0 : index
    %127 = vector.load %arg8[%c80_119, %c0_120] : memref<144x512xbf16, #tpu.memory_space<vmem>>, vector<16x256xbf16>
    tpu.vector_store %arg8[%c80_119, %c0_120], %126 {strides = array<i32>} : memref<144x512xbf16, #tpu.memory_space<vmem>>, vector<16x256xbf16>,
    %c0_121 = arith.constant 0 : index
    %c641_122 = arith.constant 641 : index
    %128 = vector.load %arg7[%c0_121, %c641_122] : memref<16x1024xbf16, #tpu.memory_space<vmem>>, vector<16x256xbf16>
    %129 = arith.select %24, %128, %25 : vector<16x256xi1>, vector<16x256xbf16>
    %c80_123 = arith.constant 80 : index
    %c256_124 = arith.constant 256 : index
    %130 = vector.load %arg8[%c80_123, %c256_124] : memref<144x512xbf16, #tpu.memory_space<vmem>>, vector<16x256xbf16>
    tpu.vector_store %arg8[%c80_123, %c256_124], %129 {strides = array<i32>} : memref<144x512xbf16, #tpu.memory_space<vmem>>, vector<16x256xbf16>,
    %c0_125 = arith.constant 0 : index
    %c143_126 = arith.constant 143 : index
    %131 = vector.load %arg7[%c0_125, %c143_126] : memref<16x1024xbf16, #tpu.memory_space<vmem>>, vector<16x256xbf16>
    %132 = arith.select %20, %131, %25 : vector<16x256xi1>, vector<16x256xbf16>
    %c96_127 = arith.constant 96 : index
    %c0_128 = arith.constant 0 : index
    %133 = vector.load %arg8[%c96_127, %c0_128] : memref<144x512xbf16, #tpu.memory_space<vmem>>, vector<16x256xbf16>
    tpu.vector_store %arg8[%c96_127, %c0_128], %132 {strides = array<i32>} : memref<144x512xbf16, #tpu.memory_space<vmem>>, vector<16x256xbf16>,
    %c0_129 = arith.constant 0 : index
    %c655_130 = arith.constant 655 : index
    %134 = vector.load %arg7[%c0_129, %c655_130] : memref<16x1024xbf16, #tpu.memory_space<vmem>>, vector<16x256xbf16>
    %135 = arith.select %20, %134, %25 : vector<16x256xi1>, vector<16x256xbf16>
    %c96_131 = arith.constant 96 : index
    %c256_132 = arith.constant 256 : index
    %136 = vector.load %arg8[%c96_131, %c256_132] : memref<144x512xbf16, #tpu.memory_space<vmem>>, vector<16x256xbf16>
    tpu.vector_store %arg8[%c96_131, %c256_132], %135 {strides = array<i32>} : memref<144x512xbf16, #tpu.memory_space<vmem>>, vector<16x256xbf16>,
    %c0_133 = arith.constant 0 : index
    %c144_134 = arith.constant 144 : index
    %137 = vector.load %arg7[%c0_133, %c144_134] : memref<16x1024xbf16, #tpu.memory_space<vmem>>, vector<16x256xbf16>
    %c112_135 = arith.constant 112 : index
    %c0_136 = arith.constant 0 : index
    %138 = vector.load %arg8[%c112_135, %c0_136] : memref<144x512xbf16, #tpu.memory_space<vmem>>, vector<16x256xbf16>
    tpu.vector_store %arg8[%c112_135, %c0_136], %137 {strides = array<i32>} : memref<144x512xbf16, #tpu.memory_space<vmem>>, vector<16x256xbf16>,
    %c0_137 = arith.constant 0 : index
    %c656_138 = arith.constant 656 : index
    %139 = vector.load %arg7[%c0_137, %c656_138] : memref<16x1024xbf16, #tpu.memory_space<vmem>>, vector<16x256xbf16>
    %c112_139 = arith.constant 112 : index
    %c256_140 = arith.constant 256 : index
    %140 = vector.load %arg8[%c112_139, %c256_140] : memref<144x512xbf16, #tpu.memory_space<vmem>>, vector<16x256xbf16>
    tpu.vector_store %arg8[%c112_139, %c256_140], %139 {strides = array<i32>} : memref<144x512xbf16, #tpu.memory_space<vmem>>, vector<16x256xbf16>,
    %c0_141 = arith.constant 0 : index
    %c145_142 = arith.constant 145 : index
    %141 = vector.load %arg7[%c0_141, %c145_142] : memref<16x1024xbf16, #tpu.memory_space<vmem>>, vector<16x256xbf16>
    %142 = arith.select %24, %141, %25 : vector<16x256xi1>, vector<16x256xbf16>
    %c128_143 = arith.constant 128 : index
    %c0_144 = arith.constant 0 : index
    %143 = vector.load %arg8[%c128_143, %c0_144] : memref<144x512xbf16, #tpu.memory_space<vmem>>, vector<16x256xbf16>
    tpu.vector_store %arg8[%c128_143, %c0_144], %142 {strides = array<i32>} : memref<144x512xbf16, #tpu.memory_space<vmem>>, vector<16x256xbf16>,
    %c0_145 = arith.constant 0 : index
    %c657_146 = arith.constant 657 : index
    %144 = vector.load %arg7[%c0_145, %c657_146] : memref<16x1024xbf16, #tpu.memory_space<vmem>>, vector<16x256xbf16>
    %145 = arith.select %24, %144, %25 : vector<16x256xi1>, vector<16x256xbf16>
    %c128_147 = arith.constant 128 : index
    %c256_148 = arith.constant 256 : index
    %146 = vector.load %arg8[%c128_147, %c256_148] : memref<144x512xbf16, #tpu.memory_space<vmem>>, vector<16x256xbf16>
    tpu.vector_store %arg8[%c128_147, %c256_148], %145 {strides = array<i32>} : memref<144x512xbf16, #tpu.memory_space<vmem>>, vector<16x256xbf16>,
    %c0_149 = arith.constant 0 : index
    %c0_150 = arith.constant 0 : index
    %147 = vector.load %arg4[%c0_149, %c0_150] : memref<16x144xbf16, #tpu.memory_space<vmem>>, vector<16x144xbf16>
    %c0_151 = arith.constant 0 : index
    %c0_152 = arith.constant 0 : index
    %148 = vector.load %arg8[%c0_151, %c0_152] : memref<144x512xbf16, #tpu.memory_space<vmem>>, vector<144x512xbf16>
    %cst_153 = arith.constant dense<0.000000e+00> : vector<16x512xf32>
    %149 = tpu.matmul %147, %148, %cst_153 {dimension_numbers = #tpu.dot_dimension_numbers<[1], [0], [0], [1], [0, 0, 1, 1], [], []>} : vector<16x144xbf16>, vector<144x512xbf16>, vector<16x512xf32> -> vector<16x512xf32>
    %c0_154 = arith.constant 0 : index
    %c0_155 = arith.constant 0 : index
    %150 = vector.load %arg5[%c0_154, %c0_155] : memref<16x1xf32, #tpu.memory_space<vmem>>, vector<16x1xf32>
    %151 = vector.broadcast %150 : vector<16x1xf32> to vector<16x512xf32>
    %152 = arith.addf %149, %151 : vector<16x512xf32>
    %c0_156 = arith.constant 0 : index
    %c0_157 = arith.constant 0 : index
    %c0_158 = arith.constant 0 : index
    %153 = vector.load %arg1[%c0_156, %c0_157, %c0_158] : memref<2x16x256xbf16, #tpu.memory_space<vmem>>, vector<1x16x256xbf16>
    %154 = vector.shape_cast %153 : vector<1x16x256xbf16> to vector<16x256xbf16>
    %155 = arith.extf %154 : vector<16x256xbf16> to vector<16x256xf32>
    %156 = vector.extract_strided_slice %152 {offsets = [0, 0], sizes = [16, 256], strides = [1, 1]} : vector<16x512xf32> to vector<16x256xf32>
    %157 = arith.addf %156, %155 : vector<16x256xf32>
    %cst_159 = arith.constant 0.000000e+00 : f32
    %158 = vector.broadcast %cst_159 : f32 to vector<16x256xf32>
    %159 = arith.maximumf %157, %158 : vector<16x256xf32>
    %160 = arith.truncf %159 : vector<16x256xf32> to vector<16x256xbf16>
    %c0_160 = arith.constant 0 : index
    %c0_161 = arith.constant 0 : index
    %c0_162 = arith.constant 0 : index
    %161 = vector.load %arg6[%c0_160, %c0_161, %c0_162] : memref<2x16x256xbf16, #tpu.memory_space<vmem>>, vector<1x16x256xbf16>
    %162 = vector.shape_cast %161 : vector<1x16x256xbf16> to vector<16x256xbf16>
    %163 = vector.shape_cast %160 : vector<16x256xbf16> to vector<1x16x256xbf16>
    tpu.vector_store %arg6[%c0_160, %c0_161, %c0_162], %163 {strides = array<i32>} : memref<2x16x256xbf16, #tpu.memory_space<vmem>>, vector<1x16x256xbf16>,
    %c1_163 = arith.constant 1 : index
    %c0_164 = arith.constant 0 : index
    %c0_165 = arith.constant 0 : index
    %164 = vector.load %arg1[%c1_163, %c0_164, %c0_165] : memref<2x16x256xbf16, #tpu.memory_space<vmem>>, vector<1x16x256xbf16>
    %165 = vector.shape_cast %164 : vector<1x16x256xbf16> to vector<16x256xbf16>
    %166 = arith.extf %165 : vector<16x256xbf16> to vector<16x256xf32>
    %167 = vector.extract_strided_slice %152 {offsets = [0, 256], sizes = [16, 256], strides = [1, 1]} : vector<16x512xf32> to vector<16x256xf32>
    %168 = arith.addf %167, %166 : vector<16x256xf32>
    %cst_166 = arith.constant 0.000000e+00 : f32
    %169 = vector.broadcast %cst_166 : f32 to vector<16x256xf32>
    %170 = arith.maximumf %168, %169 : vector<16x256xf32>
    %171 = arith.truncf %170 : vector<16x256xf32> to vector<16x256xbf16>
    %c1_167 = arith.constant 1 : index
    %c0_168 = arith.constant 0 : index
    %c0_169 = arith.constant 0 : index
    %172 = vector.load %arg6[%c1_167, %c0_168, %c0_169] : memref<2x16x256xbf16, #tpu.memory_space<vmem>>, vector<1x16x256xbf16>
    %173 = vector.shape_cast %172 : vector<1x16x256xbf16> to vector<16x256xbf16>
    %174 = vector.shape_cast %171 : vector<16x256xbf16> to vector<1x16x256xbf16>
    tpu.vector_store %arg6[%c1_167, %c0_168, %c0_169], %174 {strides = array<i32>} : memref<2x16x256xbf16, #tpu.memory_space<vmem>>, vector<1x16x256xbf16>,
    return
  }
  func.func @transform_0(%arg0: i32) -> (i32, i32, i32) {
    %c0_i32 = arith.constant 0 : i32
    %c0_i32_0 = arith.constant 0 : i32
    %c0_i32_1 = arith.constant 0 : i32
    return %arg0, %c0_i32, %c0_i32_0 : i32, i32, i32
  }
  func.func @transform_1(%arg0: i32) -> (i32, i32) {
    %c0_i32 = arith.constant 0 : i32
    %c0_i32_0 = arith.constant 0 : i32
    %c0_i32_1 = arith.constant 0 : i32
    return %c0_i32, %c0_i32_0 : i32, i32
  }
  func.func @transform_2(%arg0: i32) -> (i32, i32) {
    %c0_i32 = arith.constant 0 : i32
    %c0_i32_0 = arith.constant 0 : i32
    %c0_i32_1 = arith.constant 0 : i32
    return %c0_i32, %c0_i32_0 : i32, i32
  }
  func.func @transform_3(%arg0: i32) -> (i32, i32) {
    %c0_i32 = arith.constant 0 : i32
    %c0_i32_0 = arith.constant 0 : i32
    %c0_i32_1 = arith.constant 0 : i32
    return %c0_i32, %c0_i32_0 : i32, i32
  }
  func.func @transform_4(%arg0: i32) -> (i32, i32) {
    %c0_i32 = arith.constant 0 : i32
    %c0_i32_0 = arith.constant 0 : i32
    %c0_i32_1 = arith.constant 0 : i32
    return %c0_i32, %c0_i32_0 : i32, i32
  }
  func.func @transform_5(%arg0: i32) -> (i32, i32, i32) {
    %c0_i32 = arith.constant 0 : i32
    %c0_i32_0 = arith.constant 0 : i32
    %c0_i32_1 = arith.constant 0 : i32
    return %arg0, %c0_i32, %c0_i32_0 : i32, i32, i32
  }
}

</mosaic_0001>

<bundles_post_ra>
// kernel: tpu_custom_call.1
= control target key start
LH: loop header
LB: loop body
LE: loop exit
PB: predicated region body
PF: predicated region fallthrough
CT: control target
= control target key end

     0   :  { %10 = vsyncpa [#allocation5], 0  ;;  %s2040_s0 = inlined_call_operand.vmem [shape: bf16[2,16,256], index: 0, kind: input, shape index: {}]   ;;  %s2041_s1 = inlined_call_operand.hbm [shape: bf16[16,144], index: 1, kind: input, shape index: {}]   ;;  %s2042_s2 = inlined_call_operand.vmem [shape: f32[16,1], index: 2, kind: input, shape index: {}]   ;;  %s2043_s3 = inlined_call_operand.hbm [shape: bf16[16,144], index: 3, kind: input, shape index: {}]   ;;  %s2044_s4 = inlined_call_operand.vmem [shape: f32[16,1], index: 4, kind: input, shape index: {}]   ;;  %s2045_s5 = inlined_call_operand.hbm [shape: bf16[2,16,256], index: 5, kind: output, shape index: {}]  }
   0x1   :  { %11 = vsyncpa [#allocation8], 0 }
   0x2   :  { %12 = vsyncpa [#allocation6], 0  ;;  %s1454_s18 = smov [#allocation4]   ;;  %s1382_s22 = scalar_lea.hbm %s2041_s1, 256 }
   0x3   :  { %s20_s19 = sshll.u32 %s1454_s18, 4  ;;  %p1383_p0 = scmp.ne.s32.totalorder %s2041_s1, %s1382_s22  ;;  %s21_s19 = int_to_ptr.vmem [resolvable:$true] %s20_s19 }
   0x4   :  { %p1386_p1 = scmp.lt.u32.totalorder %s1382_s22, %s2041_s1 }
   0x6   :  { %p1388_p2 = pnand %p1386_p1, %p1383_p0 }
   0x8   :  { %1391 = shalt.err (!%p1388_p2)
}
   0x9   :  { %s1392_s27 = scalar_lea.vmem %s21_s19, 256  ;;  %p1397_p4 = scmp.lt.s32.totalorder %s21_s19, %s21_s19 }
   0xa   :  { %p1393_p3 = scmp.ne.s32.totalorder %s21_s19, %s1392_s27  ;;  %p1398_p5 = scmp.lt.s32.totalorder %s1392_s27, %s1392_s27 }
   0xc   :  { %p1399_p6 = por %p1398_p5, %p1397_p4 }
   0xe   :  { %p1400_p7 = pnand %p1399_p6, %p1393_p3 }
  0x10   :  { %1403 = shalt.err (!%p1400_p7)
}
  0x11   :  { %s1455_s28 = smov 128   ;;  %s1456_s29 = smov 8  }
  0x12   :  { %26 = dma.hbm_to_vmem [thread:$0]  %s2041_s1, 256, %s21_s19, [#allocation5], %s1455_s28, %s1455_s28, %s1456_s29  }
  0x13   :  { %s1457_s7 = smov [#allocation7]   ;;  %s1404_s11 = scalar_lea.hbm %s2043_s3, 256 }
  0x14   :  { %s34_s8 = sshll.u32 %s1457_s7, 4  ;;  %p1405_p8 = scmp.ne.s32.totalorder %s2043_s3, %s1404_s11  ;;  %s35_s8 = int_to_ptr.vmem [resolvable:$true] %s34_s8 }
  0x15   :  { %p1408_p9 = scmp.lt.u32.totalorder %s1404_s11, %s2043_s3 }
  0x17   :  { %p1410_p10 = pnand %p1408_p9, %p1405_p8 }
  0x19   :  { %1413 = shalt.err (!%p1410_p10)
}
  0x1a   :  { %s1414_s16 = scalar_lea.vmem %s35_s8, 256  ;;  %p1419_p12 = scmp.lt.s32.totalorder %s35_s8, %s35_s8 }
  0x1b   :  { %p1415_p11 = scmp.ne.s32.totalorder %s35_s8, %s1414_s16  ;;  %p1420_p13 = scmp.lt.s32.totalorder %s1414_s16, %s1414_s16 }
  0x1d   :  { %p1421_p0 = por %p1420_p13, %p1419_p12 }
  0x1f   :  { %p1422_p1 = pnand %p1421_p0, %p1415_p11 }
  0x21   :  { %1425 = shalt.err (!%p1422_p1)
}
  0x22   :  { %40 = dma.hbm_to_vmem [thread:$0]  %s2043_s3, 256, %s35_s8, [#allocation8], %s1455_s28, %s1455_s28, %s1456_s29  }
  0x23   :  { %1448 = dma.done.wait [#allocation5], 256  }
  0x24   :  { %1449 = vsyncadd [#allocation5], 4294967040  ;;  %v52_v0 = vlaneseq }
  0x25   :  { %1450 = dma.done.wait [#allocation8], 256  }
  0x26   :  { %1451 = vsyncadd [#allocation8], 4294967040  ;;  %v1458_v1 = vmov 0   ;;  %v53_v2 = vand.u32 127, %v52_v0  ;;  %v130_v3 = vshrl.u32 %v52_v0, 7  ;;  %s1459_s3 = smov 113  }
  0x27   :  { %1330 = vset.pattern.permute.xlu0 %v1458_v1  ;;  %1331 = vset.pattern.permute.xlu1 %v1458_v1  ;;  %s1460_s18 = smov 111   ;;  %s1461_s19 = smov 127   ;;  %v1545_v15 = vld [vmem:[%s2040_s0] sm:$0xff]  ;;  %v96_v16 = vld [vmem:[%s2040_s0 + $0x8] sm:$0xff]  ;;  %v1558_v18 = vld [vmem:[%s2040_s0 + $0x10] sm:$0xff]  ;;  %vm141_vm10 = vcmask 908288  }
  0x28   :  { %v54_v4 = vadd.s32 128, %v53_v2  ;;  %v59_v5 = vand.u32 15, %v53_v2  ;;  %v131_v7 = vsub.s32 0, %v130_v3  ;;  %v135_v8 = vsub.s32 4, %v130_v3  ;;  %s1462_s20 = smov 1   ;;  %s1463_s21 = smov 15  }
  0x29   :  { %s1464_s26 = smov 17   ;;  %v1552_v17 = vcombine.low %v1545_v15, %v96_v16  ;;  %v1255_v19 = vld [vmem:[%s2040_s0 + $0x18] sm:$0xff]  ;;  %s1465_s8 = smov 16   ;;  %v1571_v21 = vcombine.high %v1545_v15, %v96_v16  ;;  %vm240_vm13 = vcmask 924672   ;;  %vm292_vm14 = vcmask 1039360   ;;  %v571_v2 = vld [vmem:[%s2042_s2 + $0x8] sm:$0xff] }
  0x2a   :  { %v66_v6 = vand.u32 15, %v54_v4  ;;  %vm85_vm0 = vcmp.ne.s32.totalorder %v59_v5, 15  ;;  %vm79_vm1 = vcmp.ne.s32.totalorder %v59_v5, 0  ;;  %v1566_v20 = vcombine.low %v1558_v18, %v1255_v19  ;;  %s1466_s9 = smov 112   ;;  %v1378_v62 = vld [vmem:[#allocation4 + $0x4] ss:$8 sps:$4 sm:$0xff]  }
  0x2b   :  { %v1578_v22 = vcombine.high %v1558_v18, %v1255_v19  ;;  %v570_v4 = vld [vmem:[%s2042_s2] sm:$0xff] }
  0x2c   :  { %vm86_vm2 = vcmp.ne.s32.totalorder %v66_v6, 15  ;;  %vm80_vm3 = vcmp.ne.s32.totalorder %v66_v6, 0 }
  0x2d   :  { %vm226_vm4 = vmpackc.low %vm86_vm2, %vm85_vm0  ;;  %vm257_vm2 = vcmask 121856  }
  0x2e   :  { %v227_v9 = vsel %vm226_vm4, 65537, %v1458_v1  ;;  %vm127_vm5 = vmpackc.low %vm80_vm3, %vm79_vm1  ;;  %vm2049_vm1 = vcmask 7168  }
  0x2f   :  { %v231_v10 = vrot.slane %v227_v9, %v131_v7  ;;  %v128_v11 = vsel %vm127_vm5, 65537, %v1458_v1  ;;  %v235_v13 = vrot.slane %v227_v9, %v135_v8  ;;  %vm158_vm5 = vcmask 138240  }
  0x30   :  { %v132_v12 = vrot.slane %v128_v11, %v131_v7  ;;  %v136_v14 = vrot.slane %v128_v11, %v135_v8 }
  0x31   :  { %236 = vrot.lane.b32.xlu1 %v231_v10, %s1459_s3 }
  0x32   :  { %137 = vrot.lane.b32.xlu0 %v132_v12, %s1460_s18 }
  0x35   :  { %238 = vrot.lane.b32.xlu1 %v235_v13, %s1459_s3 }
  0x36   :  { %139 = vrot.lane.b32.xlu0 %v136_v14, %s1460_s18 }
  0x39   :  { %290 = vrot.lane.b32.xlu1 %v136_v14, %s1461_s19 }
  0x3a   :  { %288 = vrot.lane.b32.xlu0 %v132_v12, %s1461_s19 }
  0x3d   :  { %350 = vrot.lane.b32.xlu1 %v235_v13, %s1462_s20 }
  0x3e   :  { %348 = vrot.lane.b32.xlu0 %v231_v10, %s1462_s20 }
  0x41   :  { %400 = vrot.lane.b32.xlu1 %v136_v14, %s1463_s21 }
  0x42   :  { %398 = vrot.lane.b32.xlu0 %v132_v12, %s1463_s21 }
  0x45   :  { %487 = vrot.lane.b32.xlu1 %v235_v13, %s1464_s26 }
  0x46   :  { %485 = vrot.lane.b32.xlu0 %v231_v10, %s1464_s26 }
  0x49   :  { %194 = vrot.lane.b32.xlu1 %v1552_v17, %s1465_s8 }
  0x4a   :  { %1291 = vrot.lane.b32.xlu0 %v1458_v1, %s1464_s26 }
  0x4d   :  { %213 = vrot.lane.b32.xlu1 %v1566_v20, %s1465_s8 }
  0x4e   :  { %196 = vrot.lane.b32.xlu0 %v1571_v21, %s1465_s8 }
  0x51   :  { %1296 = vrot.lane.b32.xlu1 %v1458_v1, %s1465_s8 }
  0x52   :  { %215 = vrot.lane.b32.xlu0 %v1578_v22, %s1465_s8 }
  0x55   :  { %1306 = vrot.lane.b32.xlu1 %v1458_v1, %s1462_s20 }
  0x56   :  { %1301 = vrot.lane.b32.xlu0 %v1458_v1, %s1463_s21 }
  0x59   :  { %1311 = vrot.lane.b32.xlu1 %v1458_v1, %s1461_s19 }
  0x5a   :  { %1316 = vrot.lane.b32.xlu0 %v1458_v1, %s1459_s3 }
  0xa3   :  { %v237_v23 = vpop.permute.xlu1 %236 }
  0xa4   :  { %v138_v24 = vpop.permute.xlu0 %137 }
  0xa7   :  { %v1592_v25 = vpop.permute.xlu1 %238 }
  0xa8   :  { %v1594_v26 = vpop.permute.xlu0 %139  ;;  %vm2047_vm8 = vcmp.ne.s16.totalorder %v1592_v25, 0  ;;  %v1657_v43 = vsel %vm240_vm13, %v237_v23, %v1592_v25 }
  0xa9   :  { %vm145_vm6 = vcmp.ne.s16.totalorder %v1594_v26, 0  ;;  %v247_v34 = vsel %vm2047_vm8, %v1571_v21, 0  ;;  %v269_v37 = vsel %vm2047_vm8, %v1578_v22, 0  ;;  %v1636_v38 = vsel %vm141_vm10, %v138_v24, %v1594_v26 }
  0xaa   :  { %v148_v27 = vsel %vm145_vm6, %v1571_v21, 0  ;;  %v170_v30 = vsel %vm145_vm6, %v1578_v22, 0  ;;  %vm144_vm12 = vcmp.ne.s16.totalorder %v1636_v38, 0  ;;  %vm243_vm15 = vcmp.ne.s16.totalorder %v1657_v43, 0 }
  0xab   :  { %156 = vrot.lane.b32.xlu1 %v148_v27, %s1464_s26  ;;  %v1601_v28 = vpop.permute.xlu1 %290  ;;  %v147_v41 = vsel %vm144_vm12, %v1552_v17, 0  ;;  %v169_v45 = vsel %vm144_vm12, %v1566_v20, 0  ;;  %v246_v47 = vsel %vm243_vm15, %v1552_v17, 0  ;;  %v268_v50 = vsel %vm243_vm15, %v1566_v20, 0 }
  0xac   :  { %vm2046_vm7 = vcmp.ne.s16.totalorder %v1601_v28, 0  ;;  %v289_v29 = vpop.permute.xlu0 %288  ;;  %vm198_vm8 = vcmask 130048  }
  0xad   :  { %v299_v31 = vsel %vm2046_vm7, %v1571_v21, 0  ;;  %v321_v33 = vsel %vm2046_vm7, %v1578_v22, 0  ;;  %v1662_v44 = vsel %vm292_vm14, %v289_v29, %v1601_v28  ;;  %1261 = vmatprep.mubr.msk.bf16.mxu1 %vm198_vm8, %v1378_v62  ;;  %1260 = vmatprep.mubr.msk.bf16.mxu0 %vm198_vm8, %v1378_v62 }
  0xae   :  { %307 = vrot.lane.b32.xlu0 %v299_v31, %s1462_s20  ;;  %vm295_vm0 = vcmp.ne.s16.totalorder %v1662_v44, 0 }
  0xaf   :  { %178 = vrot.lane.b32.xlu1 %v170_v30, %s1464_s26  ;;  %v351_v46 = vpop.permute.xlu1 %350  ;;  %v298_v48 = vsel %vm295_vm0, %v1552_v17, 0  ;;  %v320_v51 = vsel %vm295_vm0, %v1566_v20, 0 }
  0xb0   :  { %v1613_v32 = vpop.permute.xlu0 %348 }
  0xb1   :  { %vm353_vm9 = vcmp.ne.s16.totalorder %v1613_v32, 0  ;;  %v1689_v52 = vsel %vm2049_vm1, %v1613_v32, %v351_v46 }
  0xb2   :  { %329 = vrot.lane.b32.xlu0 %v321_v33, %s1462_s20  ;;  %v377_v35 = vsel %vm353_vm9, %v1566_v20, 0  ;;  %v356_v40 = vsel %vm353_vm9, %v1552_v17, 0  ;;  %vm354_vm3 = vcmp.ne.s16.totalorder %v1689_v52, 0 }
  0xb3   :  { %255 = vrot.lane.b32.xlu1 %v247_v34, %s1463_s21  ;;  %v401_v49 = vpop.permute.xlu1 %400  ;;  %v357_v56 = vsel %vm354_vm3, %v1571_v21, 0  ;;  %v378_v59 = vsel %vm354_vm3, %v1578_v22, 0 }
  0xb4   :  { %v1627_v36 = vpop.permute.xlu0 %398 }
  0xb5   :  { %vm403_vm11 = vcmp.ne.s16.totalorder %v1627_v36, 0  ;;  %v1694_v53 = vsel %vm257_vm2, %v1627_v36, %v401_v49 }
  0xb6   :  { %383 = vrot.lane.b32.xlu0 %v377_v35, %s1461_s19  ;;  %v406_v39 = vsel %vm403_vm11, %v1552_v17, 0  ;;  %v427_v42 = vsel %vm403_vm11, %v1566_v20, 0  ;;  %vm2048_vm4 = vcmp.ne.s16.totalorder %v1694_v53, 0 }
  0xb7   :  { %277 = vrot.lane.b32.xlu1 %v269_v37, %s1463_s21  ;;  %v488_v54 = vpop.permute.xlu1 %487  ;;  %v407_v57 = vsel %vm2048_vm4, %v1571_v21, 0  ;;  %v428_v60 = vsel %vm2048_vm4, %v1578_v22, 0 }
  0xb8   :  { %v1702_v55 = vpop.permute.xlu0 %485 }
  0xb9   :  { %v1713_v58 = vsel %vm158_vm5, %v1702_v55, %v488_v54  ;;  %vm490_vm4 = vcmp.ne.s16.totalorder %v1702_v55, 0 }
  0xba   :  { %412 = vrot.lane.b32.xlu0 %v406_v39, %s1459_s3  ;;  %vm491_vm7 = vcmp.ne.s16.totalorder %v1713_v58, 0  ;;  %v514_v0 = vsel %vm490_vm4, %v1566_v20, 0  ;;  %v493_v3 = vsel %vm490_vm4, %v1552_v17, 0  ;;  %v1068_v58 = vld [vmem:[%s2044_s4 + $0x8] sm:$0xff] }
  0xbb   :  { %362 = vrot.lane.b32.xlu1 %v356_v40, %s1461_s19  ;;  %v494_v61 = vsel %vm491_vm7, %v1571_v21, 0  ;;  %v515_v63 = vsel %vm491_vm7, %v1578_v22, 0  ;;  %v195_v5 = vpop.permute.xlu1 %194 }
  0xbc   :  { %v1292_v6 = vpop.permute.xlu0 %1291 }
  0xbd   :  { %v1293_v34 = vunpack.i.l.bf16 %v1292_v6 }
  0xbe   :  { %154 = vrot.lane.b32.xlu0 %v147_v41, %s1464_s26 }
  0xbf   :  { %433 = vrot.lane.b32.xlu1 %v427_v42, %s1459_s3  ;;  %v214_v7 = vpop.permute.xlu1 %213  ;;  %v1294_v42 = vunpack.i.h.bf16 %v1292_v6 }
  0xc0   :  { %v197_v8 = vpop.permute.xlu0 %196 }
  0xc2   :  { %176 = vrot.lane.b32.xlu0 %v169_v45, %s1464_s26  ;;  %v200_v45 = vsel %vm198_vm8, %v195_v5, %v197_v8 }
  0xc3   :  { %1321 = vrot.lane.b32.xlu1 %v1458_v1, %s1466_s9  ;;  %v1297_v9 = vpop.permute.xlu1 %1296 }
  0xc4   :  { %v216_v10 = vpop.permute.xlu0 %215  ;;  %v1298_v41 = vunpack.i.l.bf16 %v1297_v9 }
  0xc6   :  { %253 = vrot.lane.b32.xlu0 %v246_v47, %s1463_s21 }
  0xc7   :  { %305 = vrot.lane.b32.xlu1 %v298_v48, %s1462_s20  ;;  %v1760_v11 = vpop.permute.xlu1 %1306 }
  0xc8   :  { %v1302_v12 = vpop.permute.xlu0 %1301 }
  0xc9   :  { %v1303_v54 = vunpack.i.l.bf16 %v1302_v12 }
  0xca   :  { %275 = vrot.lane.b32.xlu0 %v268_v50, %s1463_s21  ;;  %v1299_v50 = vunpack.i.h.bf16 %v1297_v9  ;;  %v1309_v9 = vunpack.i.h.bf16 %v1760_v11 }
  0xcb   :  { %327 = vrot.lane.b32.xlu1 %v320_v51, %s1462_s20  ;;  %v1762_v13 = vpop.permute.xlu1 %1311  ;;  %v199_v51 = vsel %vm198_vm8, %v1298_v41, %v195_v5 }
  0xcc   :  { %v1764_v14 = vpop.permute.xlu0 %1316  ;;  %v217_v62 = vsel %vm198_vm8, %v1299_v50, %v214_v7 }
  0xce   :  { %453 = vrot.lane.b32.xlu0 %v1571_v21, %s1466_s9 }
  0xcf   :  { %451 = vrot.lane.b32.xlu1 %v1552_v17, %s1466_s9 }
  0xd2   :  { %364 = vrot.lane.b32.xlu0 %v357_v56, %s1461_s19  ;;  %v218_v56 = vsel %vm198_vm8, %v214_v7, %v216_v10 }
  0xd3   :  { %414 = vrot.lane.b32.xlu1 %v407_v57, %s1459_s3 }
  0xd6   :  { %385 = vrot.lane.b32.xlu0 %v378_v59, %s1461_s19 }
  0xd7   :  { %435 = vrot.lane.b32.xlu1 %v428_v60, %s1459_s3 }
  0xda   :  { %472 = vrot.lane.b32.xlu0 %v1578_v22, %s1466_s9 }
  0xdb   :  { %501 = vrot.lane.b32.xlu1 %v494_v61, %s1460_s18 }
  0xde   :  { %470 = vrot.lane.b32.xlu0 %v1566_v20, %s1466_s9 }
  0xdf   :  { %522 = vrot.lane.b32.xlu1 %v515_v63, %s1460_s18  ;;  %v1304_v63 = vunpack.i.h.bf16 %v1302_v12 }
  0xe2   :  { %1326 = vrot.lane.b32.xlu0 %v1458_v1, %s1460_s18 }
  0xe3   :  { %520 = vrot.lane.b32.xlu1 %v514_v0, %s1460_s18 }
  0xe6   :  { %499 = vrot.lane.b32.xlu0 %v493_v3, %s1460_s18 }
  0xe7   :  { %579 = vperm.xlu1 %1331, %v571_v2   ;;  %v1308_v2 = vunpack.i.l.bf16 %v1760_v11 }
  0xea   :  { %574 = vperm.xlu0 %1330, %v570_v4  }
  0xeb   :  { %1333 = vrot.lane.b32.xlu1 %v1458_v1, %s1464_s26 }
  0xee   :  { %1338 = vrot.lane.b32.xlu0 %v1458_v1, %s1465_s8 }
  0xef   :  { %1343 = vrot.lane.b32.xlu1 %v1458_v1, %s1463_s21 }
  0xf2   :  { %1348 = vrot.lane.b32.xlu0 %v1458_v1, %s1462_s20 }
  0xf3   :  { %1358 = vrot.lane.b32.xlu1 %v1458_v1, %s1459_s3 }
  0xf6   :  { %1353 = vrot.lane.b32.xlu0 %v1458_v1, %s1461_s19 }
 0x11d   :  { %v157_v16 = vpop.permute.xlu1 %156 }
 0x120   :  { %v308_v19 = vpop.permute.xlu0 %307 }
 0x121   :  { %v179_v23 = vpop.permute.xlu1 %178 }
 0x124   :  { %v330_v24 = vpop.permute.xlu0 %329 }
 0x125   :  { %v256_v27 = vpop.permute.xlu1 %255 }
 0x128   :  { %v1766_v29 = vpop.permute.xlu0 %383 }
 0x129   :  { %v278_v30 = vpop.permute.xlu1 %277 }
 0x12c   :  { %v1768_v31 = vpop.permute.xlu0 %412 }
 0x12d   :  { %v363_v33 = vpop.permute.xlu1 %362 }
 0x130   :  { %v155_v35 = vpop.permute.xlu0 %154 }
 0x131   :  { %v1770_v37 = vpop.permute.xlu1 %433  ;;  %v160_v39 = vsel %vm158_vm5, %v155_v35, %v157_v16  ;;  %v159_v40 = vsel %vm158_vm5, %v1293_v34, %v155_v35 }
 0x132   :  { %595 = vmatprep.subr.bf16.mxu0 %v160_v39 }
 0x133   :  { %596 = vmatpush1.bf16.msra.mxu0 %v159_v40 }
 0x134   :  { %597 = vmatprep.subr.bf16.mxu0 %v200_v45  ;;  %v177_v46 = vpop.permute.xlu0 %176 }
 0x135   :  { %v1775_v47 = vpop.permute.xlu1 %1321  ;;  %v181_v48 = vsel %vm158_vm5, %v177_v46, %v179_v23  ;;  %v180_v49 = vsel %vm158_vm5, %v1294_v42, %v177_v46 }
 0x136   :  { %638 = vmatprep.subr.bf16.mxu1 %v181_v48  ;;  %v1323_v35 = vunpack.i.l.bf16 %v1775_v47  ;;  %v1324_v42 = vunpack.i.h.bf16 %v1775_v47 }
 0x137   :  { %598 = vmatpush1.bf16.msra.mxu0 %v199_v51  ;;  %639 = vmatpush1.bf16.msra.mxu1 %v180_v49 }
 0x138   :  { %640 = vmatprep.subr.bf16.mxu1 %v218_v56  ;;  %v254_v57 = vpop.permute.xlu0 %253 }
 0x139   :  { %v306_v59 = vpop.permute.xlu1 %305  ;;  %v259_v60 = vsel %vm257_vm2, %v254_v57, %v256_v27  ;;  %v258_v61 = vsel %vm257_vm2, %v1303_v54, %v254_v57  ;;  %v1318_v27 = vunpack.i.l.bf16 %v1764_v14 }
 0x13a   :  { %599 = vmatprep.subr.bf16.mxu0 %v259_v60  ;;  %v311_v0 = vsel %vm2049_vm1, %v306_v59, %v308_v19  ;;  %v310_v8 = vsel %vm2049_vm1, %v1308_v2, %v306_v59  ;;  %v1313_v19 = vunpack.i.l.bf16 %v1762_v13 }
 0x13b   :  { %600 = vmatpush1.bf16.msra.mxu0 %v258_v61  ;;  %641 = vmatpush1.bf16.msra.mxu1 %v217_v62  ;;  %v1376_v61 = vld [vmem:[#allocation4] ss:$8 sps:$4 sm:$0xff]  }
 0x13c   :  { %601 = vmatprep.subr.bf16.mxu0 %v311_v0  ;;  %v276_v3 = vpop.permute.xlu0 %275 }
 0x13d   :  { %v328_v4 = vpop.permute.xlu1 %327  ;;  %v280_v5 = vsel %vm257_vm2, %v276_v3, %v278_v30  ;;  %v279_v6 = vsel %vm257_vm2, %v1304_v63, %v276_v3 }
 0x13e   :  { %642 = vmatprep.subr.bf16.mxu1 %v280_v5  ;;  %v332_v7 = vsel %vm2049_vm1, %v328_v4, %v330_v24  ;;  %v331_v16 = vsel %vm2049_vm1, %v1309_v9, %v328_v4  ;;  %vm457_vm1 = vcmask 916480  }
 0x13f   :  { %602 = vmatpush1.bf16.msra.mxu0 %v310_v8  ;;  %643 = vmatpush1.bf16.msra.mxu1 %v279_v6 }
 0x140   :  { %644 = vmatprep.subr.bf16.mxu1 %v332_v7  ;;  %v454_v10 = vpop.permute.xlu0 %453  ;;  %603 = vmatprep.subr.bf16.mxu0 %v1571_v21  ;;  %v1314_v21 = vunpack.i.h.bf16 %v1762_v13 }
 0x141   :  { %v452_v12 = vpop.permute.xlu1 %451 }
 0x142   :  { %v458_v46 = vsel %vm457_vm1, %v452_v12, %v454_v10 }
 0x143   :  { %604 = vmatpush1.bf16.msra.mxu0 %v1552_v17  ;;  %645 = vmatpush1.bf16.msra.mxu1 %v331_v16 }
 0x144   :  { %v365_v23 = vpop.permute.xlu0 %364  ;;  %646 = vmatprep.subr.bf16.mxu1 %v1578_v22  ;;  %v1319_v22 = vunpack.i.h.bf16 %v1764_v14 }
 0x145   :  { %v415_v24 = vpop.permute.xlu1 %414  ;;  %v369_v11 = vsel %vm292_vm14, %v365_v23, %v1313_v19  ;;  %v368_v30 = vsel %vm292_vm14, %v363_v33, %v365_v23 }
 0x146   :  { %605 = vmatprep.subr.bf16.mxu0 %v369_v11  ;;  %v419_v34 = vsel %vm240_vm13, %v415_v24, %v1318_v27  ;;  %v418_v13 = vsel %vm240_vm13, %v1768_v31, %v415_v24 }
 0x147   :  { %606 = vmatpush1.bf16.msra.mxu0 %v368_v30  ;;  %647 = vmatpush1.bf16.msra.mxu1 %v1566_v20  ;;  %v459_v20 = vsel %vm457_vm1, %v454_v10, %v1323_v35 }
 0x148   :  { %607 = vmatprep.subr.bf16.mxu0 %v419_v34  ;;  %v386_v17 = vpop.permute.xlu0 %385 }
 0x149   :  { %v436_v39 = vpop.permute.xlu1 %435  ;;  %v390_v40 = vsel %vm292_vm14, %v386_v17, %v1314_v21  ;;  %v389_v33 = vsel %vm292_vm14, %v1766_v29, %v386_v17 }
 0x14a   :  { %648 = vmatprep.subr.bf16.mxu1 %v390_v40  ;;  %v440_v41 = vsel %vm240_vm13, %v436_v39, %v1319_v22  ;;  %v439_v29 = vsel %vm240_vm13, %v1770_v37, %v436_v39 }
 0x14b   :  { %608 = vmatpush1.bf16.msra.mxu0 %v418_v13  ;;  %649 = vmatpush1.bf16.msra.mxu1 %v389_v33 }
 0x14c   :  { %609 = vmatprep.subr.bf16.mxu0 %v459_v20  ;;  %650 = vmatprep.subr.bf16.mxu1 %v440_v41  ;;  %v473_v14 = vpop.permute.xlu0 %472 }
 0x14d   :  { %v502_v45 = vpop.permute.xlu1 %501  ;;  %v477_v31 = vsel %vm457_vm1, %v473_v14, %v1324_v42 }
 0x14f   :  { %610 = vmatpush1.bf16.msra.mxu0 %v458_v46  ;;  %651 = vmatpush1.bf16.msra.mxu1 %v439_v29 }
 0x150   :  { %652 = vmatprep.subr.bf16.mxu1 %v477_v31  ;;  %v471_v48 = vpop.permute.xlu0 %470 }
 0x151   :  { %v523_v49 = vpop.permute.xlu1 %522  ;;  %v476_v50 = vsel %vm457_vm1, %v471_v48, %v473_v14 }
 0x153   :  { %653 = vmatpush1.bf16.msra.mxu1 %v476_v50 }
 0x154   :  { %v1327_v51 = vpop.permute.xlu0 %1326 }
 0x155   :  { %v521_v54 = vpop.permute.xlu1 %520  ;;  %v1329_v56 = vunpack.i.h.bf16 %v1327_v51  ;;  %v1328_v47 = vunpack.i.l.bf16 %v1327_v51 }
 0x156   :  { %v526_v37 = vsel %vm141_vm10, %v521_v54, %v523_v49 }
 0x157   :  { %v506_v57 = vsel %vm141_vm10, %v502_v45, %v1328_v47  ;;  %v527_v59 = vsel %vm141_vm10, %v523_v49, %v1329_v56  ;;  %v1379_v47 = vld [vmem:[#allocation7 + $0x4] ss:$8 sps:$4 sm:$0xff]  }
 0x158   :  { %v500_v60 = vpop.permute.xlu0 %499  ;;  %611 = vmatprep.subr.bf16.mxu0 %v506_v57  ;;  %654 = vmatprep.subr.bf16.mxu1 %v527_v59 }
 0x159   :  { %655 = vmatpush1.bf16.msra.mxu1 %v526_v37  ;;  %v505_v62 = vsel %vm141_vm10, %v500_v60, %v502_v45 }
 0x15a   :  { %612 = vmatpush1.bf16.msra.mxu0 %v505_v62 }
 0x15c   :  { %671 = vmatmul.mubr.bf16.vlgmr.msra.gmra.mrb[0].mxu1 %v1376_v61 }
 0x15d   :  { %628 = vmatmul.mubr.bf16.vlgmr.msra.gmra.mrb[0].mxu0 %v1376_v61  ;;  %1265 = vmatprep.mubr.msk.bf16.mxu1 %vm198_vm8, %v1379_v47 }
 0x15e   :  { %1264 = vmatprep.mubr.msk.bf16.mxu0 %vm198_vm8, %v1379_v47 }
 0x166   :  { %v580_v2 = vpop.permute.xlu1 %579 }
 0x169   :  { %v575_v63 = vpop.permute.xlu0 %574 }
 0x16a   :  { %v1334_v37 = vpop.permute.xlu1 %1333 }
 0x16d   :  { %v1339_v60 = vpop.permute.xlu0 %1338 }
 0x16e   :  { %v1344_v62 = vpop.permute.xlu1 %1343 }
 0x171   :  { %v1961_v61 = vpop.permute.xlu0 %1348 }
 0x172   :  { %v1965_v55 = vpop.permute.xlu1 %1358 }
 0x22f   :  { %v672_v0 = vpop.f32.mrb[0].mxu1 }
 0x230   :  { %v629_v3 = vpop.f32.mrb[0].mxu0  ;;  %v674_v4 = vpop.f32.mrb[1].mxu1  ;;  %v673_v5 = vadd.f32 %v672_v0, %v575_v63 }
 0x231   :  { %v630_v6 = vadd.f32 %v629_v3, %v575_v63  ;;  %v675_v8 = vadd.f32 %v674_v4, %v575_v63  ;;  %v631_v7 = vpop.f32.mrb[1].mxu0  ;;  %v676_v9 = vpop.f32.mrb[2].mxu1 }
 0x232   :  { %v632_v10 = vadd.f32 %v631_v7, %v575_v63  ;;  %v677_v12 = vadd.f32 %v676_v9, %v580_v2  ;;  %v683_v16 = vmax.f32 %v673_v5, 0.0  ;;  %v633_v19 = vpop.f32.mrb[2].mxu0  ;;  %v678_v23 = vpop.f32.mrb[3].mxu1 }
 0x233   :  { %v684_v27 = vmax.f32 %v675_v8, 0.0  ;;  %v634_v24 = vadd.f32 %v633_v19, %v580_v2  ;;  %v679_v11 = vadd.f32 %v678_v23, %v580_v2  ;;  %v635_v30 = vpop.f32.mrb[3].mxu0  ;;  %v681_v17 = vmax.f32 %v630_v6, 0.0  ;;  %v1963_v63 = vpop.permute.xlu0 %1353 }
 0x234   :  { %v687_v21 = vmax.f32 %v677_v12, 0.0  ;;  %v636_v34 = vadd.f32 %v635_v30, %v580_v2  ;;  %v682_v39 = vmax.f32 %v632_v10, 0.0  ;;  %v1335_v19 = vunpack.i.l.bf16 %v1334_v37 }
 0x235   :  { %v685_v22 = vmax.f32 %v634_v24, 0.0  ;;  %v688_v35 = vmax.f32 %v679_v11, 0.0 }
 0x236   :  { %v1829_v40 = vpack.c.bf16 %v687_v21, %v683_v16  ;;  %v686_v33 = vmax.f32 %v636_v34, 0.0  ;;  %v1340_v21 = vunpack.i.l.bf16 %v1339_v60  ;;  %v1336_v34 = vunpack.i.h.bf16 %v1334_v37 }
 0x237   :  { %v1831_v13 = vpack.c.bf16 %v685_v22, %v681_v17  ;;  %v1833_v20 = vpack.c.bf16 %v688_v35, %v684_v27 }
 0x238   :  { %v1835_v41 = vpack.c.bf16 %v686_v33, %v682_v39  ;;  %v722_v42 = vsel %vm144_vm12, %v1829_v40, 0  ;;  %v842_v46 = vsel %vm295_vm0, %v1829_v40, 0  ;;  %v933_v44 = vsel %vm403_vm11, %v1829_v40, 0 }
 0x239   :  { %747 = vrot.lane.b32.xlu0 %v1831_v13, %s1465_s8  ;;  %v701_v14 = vsel %vm144_vm12, %v1831_v13, 0  ;;  %v821_v45 = vsel %vm295_vm0, %v1831_v13, 0  ;;  %v870_v38 = vsel %vm353_vm9, %v1831_v13, 0  ;;  %v779_v29 = vsel %vm243_vm15, %v1831_v13, 0 }
 0x23a   :  { %708 = vrot.lane.b32.xlu1 %v701_v14, %s1464_s26  ;;  %v800_v31 = vsel %vm243_vm15, %v1829_v40, 0  ;;  %v702_v48 = vsel %vm145_vm6, %v1835_v41, 0  ;;  %v891_v49 = vsel %vm353_vm9, %v1829_v40, 0  ;;  %v723_v50 = vsel %vm145_vm6, %v1833_v20, 0 }
 0x23b   :  { %v912_v43 = vsel %vm403_vm11, %v1831_v13, 0  ;;  %vm2050_vm12 = vcmp.ne.s16.totalorder %v1592_v25, 0  ;;  %vm2052_vm9 = vcmp.ne.s16.totalorder %v1601_v28, 0  ;;  %v871_v25 = vsel %vm354_vm3, %v1835_v41, 0 }
 0x23c   :  { %v780_v51 = vsel %vm2050_vm12, %v1835_v41, 0  ;;  %vm2051_vm6 = vmmov %vm2050_vm12  ;;  %v822_v32 = vsel %vm2052_vm9, %v1835_v41, 0  ;;  %vm2054_vm15 = vcmp.ne.s16.totalorder %v1694_v53, 0  ;;  %v892_v28 = vsel %vm354_vm3, %v1833_v20, 0 }
 0x23d   :  { %765 = vrot.lane.b32.xlu0 %v1829_v40, %s1465_s8  ;;  %v801_v26 = vsel %vm2051_vm6, %v1833_v20, 0  ;;  %vm2053_vm11 = vmmov %vm2052_vm9  ;;  %v913_v54 = vsel %vm2054_vm15, %v1835_v41, 0  ;;  %v991_v57 = vsel %vm491_vm7, %v1835_v41, 0  ;;  %v1012_v52 = vsel %vm491_vm7, %v1833_v20, 0 }
 0x23e   :  { %729 = vrot.lane.b32.xlu1 %v722_v42, %s1464_s26  ;;  %v843_v36 = vsel %vm2053_vm11, %v1833_v20, 0  ;;  %vm2055_vm0 = vmmov %vm2054_vm15  ;;  %v1011_v53 = vsel %vm490_vm4, %v1829_v40, 0  ;;  %v990_v59 = vsel %vm490_vm4, %v1831_v13, 0  ;;  %v1341_v42 = vunpack.i.h.bf16 %v1339_v60 }
 0x23f   :  { %v934_v56 = vsel %vm2055_vm0, %v1833_v20, 0  ;;  %vm2056_vm7 = vcmask 7168  }
 0x240   :  { %vm2057_vm3 = vmmov %vm2056_vm7 }
 0x241   :  { %828 = vrot.lane.b32.xlu0 %v821_v45, %s1462_s20  ;;  %v1345_v45 = vunpack.i.l.bf16 %v1344_v62  ;;  %vm2059_vm4 = vmmov %vm2057_vm3 }
 0x242   :  { %749 = vrot.lane.b32.xlu1 %v1835_v41, %s1465_s8 }
 0x245   :  { %849 = vrot.lane.b32.xlu0 %v842_v46, %s1462_s20 }
 0x246   :  { %767 = vrot.lane.b32.xlu1 %v1833_v20, %s1465_s8 }
 0x249   :  { %876 = vrot.lane.b32.xlu0 %v870_v38, %s1461_s19 }
 0x24a   :  { %786 = vrot.lane.b32.xlu1 %v779_v29, %s1463_s21 }
 0x24d   :  { %939 = vrot.lane.b32.xlu0 %v933_v44, %s1459_s3 }
 0x24e   :  { %807 = vrot.lane.b32.xlu1 %v800_v31, %s1463_s21 }
 0x251   :  { %710 = vrot.lane.b32.xlu0 %v702_v48, %s1464_s26  ;;  %v1346_v48 = vunpack.i.h.bf16 %v1344_v62 }
 0x252   :  { %897 = vrot.lane.b32.xlu1 %v891_v49, %s1461_s19 }
 0x255   :  { %731 = vrot.lane.b32.xlu0 %v723_v50, %s1464_s26  ;;  %v1350_v50 = vunpack.i.l.bf16 %v1961_v61 }
 0x256   :  { %918 = vrot.lane.b32.xlu1 %v912_v43, %s1459_s3 }
 0x259   :  { %788 = vrot.lane.b32.xlu0 %v780_v51, %s1463_s21 }
 0x25a   :  { %959 = vrot.lane.b32.xlu1 %v1835_v41, %s1466_s9 }
 0x25d   :  { %809 = vrot.lane.b32.xlu0 %v801_v26, %s1463_s21 }
 0x25e   :  { %830 = vrot.lane.b32.xlu1 %v822_v32, %s1462_s20 }
 0x261   :  { %1363 = vrot.lane.b32.xlu0 %v1458_v1, %s1466_s9 }
 0x262   :  { %851 = vrot.lane.b32.xlu1 %v843_v36, %s1462_s20 }
 0x265   :  { %957 = vrot.lane.b32.xlu0 %v1831_v13, %s1466_s9 }
 0x266   :  { %878 = vrot.lane.b32.xlu1 %v871_v25, %s1461_s19 }
 0x269   :  { %920 = vrot.lane.b32.xlu0 %v913_v54, %s1459_s3  ;;  %v1351_v54 = vunpack.i.h.bf16 %v1961_v61 }
 0x26a   :  { %899 = vrot.lane.b32.xlu1 %v892_v28, %s1461_s19 }
 0x26d   :  { %941 = vrot.lane.b32.xlu0 %v934_v56, %s1459_s3 }
 0x26e   :  { %977 = vrot.lane.b32.xlu1 %v1833_v20, %s1466_s9 }
 0x271   :  { %998 = vrot.lane.b32.xlu0 %v991_v57, %s1460_s18  ;;  %v1355_v57 = vunpack.i.l.bf16 %v1963_v63 }
 0x272   :  { %975 = vrot.lane.b32.xlu1 %v1829_v40, %s1466_s9 }
 0x275   :  { %1019 = vrot.lane.b32.xlu0 %v1012_v52, %s1460_s18 }
 0x276   :  { %1368 = vrot.lane.b32.xlu1 %v1458_v1, %s1460_s18  ;;  %v1067_v1 = vld [vmem:[%s2044_s4] sm:$0xff] }
 0x279   :  { %1017 = vrot.lane.b32.xlu0 %v1011_v53, %s1460_s18 }
 0x27a   :  { %996 = vrot.lane.b32.xlu1 %v990_v59, %s1460_s18 }
 0x27d   :  { %1076 = vperm.xlu0 %1330, %v1068_v58  }
 0x27e   :  { %1071 = vperm.xlu1 %1331, %v1067_v1   ;;  %v1356_v1 = vunpack.i.h.bf16 %v1963_v63 }
 0x2ab   :  { %v748_v0 = vpop.permute.xlu0 %747 }
 0x2ac   :  { %v709_v2 = vpop.permute.xlu1 %708  ;;  %v751_v39 = vsel %vm198_vm8, %v1340_v21, %v748_v0 }
 0x2ad   :  { %v712_v11 = vsel %vm158_vm5, %v1335_v19, %v709_v2 }
 0x2af   :  { %v766_v3 = vpop.permute.xlu0 %765 }
 0x2b0   :  { %v730_v4 = vpop.permute.xlu1 %729  ;;  %v769_v44 = vsel %vm198_vm8, %v1341_v42, %v766_v3 }
 0x2b1   :  { %v733_v33 = vsel %vm158_vm5, %v1336_v34, %v730_v4  ;;  %v1381_v34 = vld [vmem:[#allocation7] ss:$8 sps:$4 sm:$0xff]  }
 0x2b3   :  { %v829_v5 = vpop.permute.xlu0 %828 }
 0x2b4   :  { %v750_v6 = vpop.permute.xlu1 %749  ;;  %v832_v36 = vsel %vm2057_vm3, %v1350_v50, %v829_v5 }
 0x2b5   :  { %v752_v30 = vsel %vm198_vm8, %v748_v0, %v750_v6  ;;  %v1361_v0 = vunpack.i.h.bf16 %v1965_v55 }
 0x2b7   :  { %v850_v8 = vpop.permute.xlu0 %849 }
 0x2b8   :  { %v768_v7 = vpop.permute.xlu1 %767  ;;  %v853_v47 = vsel %vm2059_vm4, %v1351_v54, %v850_v8 }
 0x2b9   :  { %v770_v14 = vsel %vm198_vm8, %v766_v3, %v768_v7  ;;  %vm2058_vm8 = vmmov %vm2057_vm3 }
 0x2bb   :  { %v877_v9 = vpop.permute.xlu0 %876 }
 0x2bc   :  { %v787_v10 = vpop.permute.xlu1 %786 }
 0x2bd   :  { %v790_v31 = vsel %vm257_vm2, %v1345_v45, %v787_v10  ;;  %v1179_v45 = vunpack.c.l.bf16 %v1545_v15 }
 0x2bf   :  { %v1967_v12 = vpop.permute.xlu0 %939 }
 0x2c0   :  { %v808_v16 = vpop.permute.xlu1 %807 }
 0x2c1   :  { %v811_v26 = vsel %vm257_vm2, %v1346_v48, %v808_v16 }
 0x2c3   :  { %v711_v23 = vpop.permute.xlu0 %710 }
 0x2c4   :  { %v1969_v27 = vpop.permute.xlu1 %897  ;;  %v713_v24 = vsel %vm158_vm5, %v709_v2, %v711_v23 }
 0x2c5   :  { %1091 = vmatprep.subr.bf16.mxu0 %v713_v24 }
 0x2c6   :  { %1092 = vmatpush1.bf16.msra.mxu0 %v712_v11 }
 0x2c7   :  { %v732_v17 = vpop.permute.xlu0 %731  ;;  %1093 = vmatprep.subr.bf16.mxu0 %v752_v30 }
 0x2c8   :  { %v919_v22 = vpop.permute.xlu1 %918  ;;  %v734_v35 = vsel %vm158_vm5, %v730_v4, %v732_v17 }
 0x2c9   :  { %1134 = vmatprep.subr.bf16.mxu1 %v734_v35 }
 0x2ca   :  { %1094 = vmatpush1.bf16.msra.mxu0 %v751_v39  ;;  %1135 = vmatpush1.bf16.msra.mxu1 %v733_v33  ;;  %v1207_v39 = vunpack.c.l.bf16 %v1558_v18  ;;  %v1178_v33 = vld [vmem:[%s2040_s0 + $0x8] sm:$0xff] }
 0x2cb   :  { %v789_v46 = vpop.permute.xlu0 %788  ;;  %1136 = vmatprep.subr.bf16.mxu1 %v770_v14 }
 0x2cc   :  { %v960_v38 = vpop.permute.xlu1 %959  ;;  %v791_v29 = vsel %vm257_vm2, %v787_v10, %v789_v46  ;;  %v1208_v46 = vunpack.c.h.bf16 %v1558_v18 }
 0x2cd   :  { %1095 = vmatprep.subr.bf16.mxu0 %v791_v29 }
 0x2ce   :  { %1096 = vmatpush1.bf16.msra.mxu0 %v790_v31  ;;  %1137 = vmatpush1.bf16.msra.mxu1 %v769_v44  ;;  %v1180_v31 = vunpack.c.h.bf16 %v1545_v15 }
 0x2cf   :  { %v810_v49 = vpop.permute.xlu0 %809 }
 0x2d0   :  { %v831_v43 = vpop.permute.xlu1 %830  ;;  %v812_v51 = vsel %vm257_vm2, %v808_v16, %v810_v49 }
 0x2d1   :  { %1138 = vmatprep.subr.bf16.mxu1 %v812_v51  ;;  %v833_v32 = vsel %vm2056_vm7, %v829_v5, %v831_v43 }
 0x2d2   :  { %1097 = vmatprep.subr.bf16.mxu0 %v833_v32  ;;  %1139 = vmatpush1.bf16.msra.mxu1 %v811_v26  ;;  %v1181_v26 = vunpack.c.l.bf16 %v1178_v33 }
 0x2d3   :  { %v1364_v25 = vpop.permute.xlu0 %1363  ;;  %1098 = vmatpush1.bf16.msra.mxu0 %v832_v36 }
 0x2d4   :  { %1099 = vmatprep.subr.bf16.mxu0 %v1835_v41  ;;  %v852_v28 = vpop.permute.xlu1 %851  ;;  %v1360_v41 = vunpack.i.l.bf16 %v1965_v55  ;;  %v1365_v60 = vunpack.i.l.bf16 %v1364_v25  ;;  %v1366_v5 = vunpack.i.h.bf16 %v1364_v25 }
 0x2d5   :  { %v854_v56 = vsel %vm2058_vm8, %v850_v8, %v852_v28 }
 0x2d6   :  { %1140 = vmatprep.subr.bf16.mxu1 %v854_v56  ;;  %v964_v3 = vsel %vm457_vm1, %v960_v38, %v1365_v60 }
 0x2d7   :  { %v958_v52 = vpop.permute.xlu0 %957  ;;  %1100 = vmatpush1.bf16.msra.mxu0 %v1831_v13  ;;  %1141 = vmatpush1.bf16.msra.mxu1 %v853_v47  ;;  %v1182_v47 = vunpack.c.h.bf16 %v1178_v33 }
 0x2d8   :  { %1142 = vmatprep.subr.bf16.mxu1 %v1833_v20  ;;  %v879_v53 = vpop.permute.xlu1 %878  ;;  %v963_v6 = vsel %vm457_vm1, %v958_v52, %v960_v38 }
 0x2d9   :  { %v882_v59 = vsel %vm292_vm14, %v877_v9, %v879_v53  ;;  %v883_v58 = vsel %vm292_vm14, %v879_v53, %v1355_v57 }
 0x2da   :  { %1101 = vmatprep.subr.bf16.mxu0 %v883_v58 }
 0x2db   :  { %v921_v37 = vpop.permute.xlu0 %920  ;;  %1102 = vmatpush1.bf16.msra.mxu0 %v882_v59  ;;  %1143 = vmatpush1.bf16.msra.mxu1 %v1829_v40 }
 0x2dc   :  { %v900_v61 = vpop.permute.xlu1 %899  ;;  %v925_v13 = vsel %vm240_vm13, %v921_v37, %v1360_v41  ;;  %v924_v2 = vsel %vm240_vm13, %v919_v22, %v921_v37  ;;  %v1269_v22 = vld [vmem:[%s2040_s0 + $0x18] sm:$0xff]  ;;  %s1467_s0 = smov [#allocation9]  }
 0x2dd   :  { %v903_v20 = vsel %vm292_vm14, %v1969_v27, %v900_v61  ;;  %1103 = vmatprep.subr.bf16.mxu0 %v925_v13  ;;  %v904_v62 = vsel %vm292_vm14, %v900_v61, %v1356_v1  ;;  %v1209_v48 = vunpack.c.l.bf16 %v1269_v22  ;;  %v1210_v32 = vunpack.c.h.bf16 %v1269_v22  ;;  %s1239_s18 = sshll.u32 %s1467_s0, 4  ;;  %s1240_s18 = int_to_ptr.vmem [resolvable:$true] %s1239_s18 }
 0x2de   :  { %1144 = vmatprep.subr.bf16.mxu1 %v904_v62  ;;  %s1426_s19 = scalar_lea.vmem %s1240_s18, 512  ;;  %p1431_p3 = scmp.lt.s32.totalorder %s1240_s18, %s1240_s18 }
 0x2df   :  { %v942_v63 = vpop.permute.xlu0 %941  ;;  %1104 = vmatpush1.bf16.msra.mxu0 %v924_v2  ;;  %1145 = vmatpush1.bf16.msra.mxu1 %v903_v20  ;;  %p1427_p2 = scmp.ne.s32.totalorder %s1240_s18, %s1426_s19  ;;  %p1432_p4 = scmp.lt.s32.totalorder %s1426_s19, %s1426_s19 }
 0x2e0   :  { %1105 = vmatprep.subr.bf16.mxu0 %v964_v3  ;;  %v978_v40 = vpop.permute.xlu1 %977  ;;  %v946_v4 = vsel %vm240_vm13, %v942_v63, %v1361_v0  ;;  %v945_v8 = vsel %vm240_vm13, %v1967_v12, %v942_v63 }
 0x2e1   :  { %1146 = vmatprep.subr.bf16.mxu1 %v946_v4  ;;  %v982_v7 = vsel %vm457_vm1, %v978_v40, %v1366_v5  ;;  %p1433_p5 = por %p1432_p4, %p1431_p3 }
 0x2e3   :  { %v999_v55 = vpop.permute.xlu0 %998  ;;  %1106 = vmatpush1.bf16.msra.mxu0 %v963_v6  ;;  %1147 = vmatpush1.bf16.msra.mxu1 %v945_v8  ;;  %p1434_p6 = pnand %p1433_p5, %p1427_p2 }
 0x2e4   :  { %1148 = vmatprep.subr.bf16.mxu1 %v982_v7  ;;  %v976_v9 = vpop.permute.xlu1 %975 }
 0x2e5   :  { %v981_v10 = vsel %vm457_vm1, %v976_v9, %v978_v40 }
 0x2e7   :  { %v1020_v16 = vpop.permute.xlu0 %1019  ;;  %1149 = vmatpush1.bf16.msra.mxu1 %v981_v10 }
 0x2e8   :  { %v1369_v19 = vpop.permute.xlu1 %1368 }
 0x2e9   :  { %v1371_v23 = vunpack.i.h.bf16 %v1369_v19  ;;  %v1370_v27 = vunpack.i.l.bf16 %v1369_v19 }
 0x2eb   :  { %v1018_v24 = vpop.permute.xlu0 %1017  ;;  %v1003_v11 = vsel %vm141_vm10, %v999_v55, %v1370_v27  ;;  %v1024_v30 = vsel %vm141_vm10, %v1020_v16, %v1371_v23 }
 0x2ec   :  { %v1023_v12 = vsel %vm141_vm10, %v1018_v24, %v1020_v16  ;;  %v997_v21 = vpop.permute.xlu1 %996  ;;  %1107 = vmatprep.subr.bf16.mxu0 %v1003_v11  ;;  %1150 = vmatprep.subr.bf16.mxu1 %v1024_v30 }
 0x2ed   :  { %v1002_v17 = vsel %vm141_vm10, %v997_v21, %v999_v55  ;;  %1151 = vmatpush1.bf16.msra.mxu1 %v1023_v12 }
 0x2ee   :  { %1108 = vmatpush1.bf16.msra.mxu0 %v1002_v17 }
 0x2f0   :  { %1167 = vmatmul.mubr.bf16.vlgmr.msra.gmra.mrb[4].mxu1 %v1381_v34 }
 0x2f1   :  { %1124 = vmatmul.mubr.bf16.vlgmr.msra.gmra.mrb[4].mxu0 %v1381_v34 }
 0x2fc   :  { %v1077_v35 = vpop.permute.xlu0 %1076 }
 0x2fd   :  { %v1072_v14 = vpop.permute.xlu1 %1071 }
 0x3c3   :  { %v1168_v42 = vpop.f32.mrb[4].mxu1 }
 0x3c4   :  { %v1169_v38 = vadd.f32 %v1168_v42, %v1072_v14  ;;  %v1125_v29 = vpop.f32.mrb[4].mxu0  ;;  %v1170_v44 = vpop.f32.mrb[5].mxu1 }
 0x3c5   :  { %v1126_v49 = vadd.f32 %v1125_v29, %v1072_v14  ;;  %v1171_v50 = vadd.f32 %v1170_v44, %v1072_v14  ;;  %v1127_v43 = vpop.f32.mrb[5].mxu0  ;;  %v1172_v51 = vpop.f32.mrb[6].mxu1 }
 0x3c6   :  { %v1211_v36 = vadd.f32 %v1207_v39, %v1169_v38  ;;  %v1128_v25 = vadd.f32 %v1127_v43, %v1072_v14  ;;  %v1173_v54 = vadd.f32 %v1172_v51, %v1077_v35  ;;  %v1129_v28 = vpop.f32.mrb[6].mxu0  ;;  %v1174_v56 = vpop.f32.mrb[7].mxu1 }
 0x3c7   :  { %v1183_v57 = vadd.f32 %v1179_v45, %v1126_v49  ;;  %v1212_v18 = vadd.f32 %v1208_v46, %v1171_v50  ;;  %v1130_v52 = vadd.f32 %v1129_v28, %v1077_v35  ;;  %v1175_v53 = vadd.f32 %v1174_v56, %v1077_v35  ;;  %v1131_v59 = vpop.f32.mrb[7].mxu0 }
 0x3c8   :  { %v1215_v58 = vmax.f32 %v1211_v36, 0.0  ;;  %v1184_v15 = vadd.f32 %v1180_v31, %v1128_v25  ;;  %v1213_v41 = vadd.f32 %v1209_v48, %v1173_v54  ;;  %v1132_v1 = vadd.f32 %v1131_v59, %v1077_v35 }
 0x3c9   :  { %v1187_v60 = vmax.f32 %v1183_v57, 0.0  ;;  %v1216_v37 = vmax.f32 %v1212_v18, 0.0  ;;  %v1185_v61 = vadd.f32 %v1181_v26, %v1130_v52  ;;  %v1214_v13 = vadd.f32 %v1210_v32, %v1175_v53 }
 0x3ca   :  { %v1188_v20 = vmax.f32 %v1184_v15, 0.0  ;;  %v1217_v62 = vmax.f32 %v1213_v41, 0.0  ;;  %v1186_v0 = vadd.f32 %v1182_v47, %v1132_v1 }
 0x3cb   :  { %v1274_v2 = vpack.c.bf16 %v1216_v37, %v1215_v58  ;;  %v1189_v63 = vmax.f32 %v1185_v61, 0.0  ;;  %v1218_v3 = vmax.f32 %v1214_v13, 0.0 }
 0x3cc   :  { %v1272_v40 = vpack.c.bf16 %v1188_v20, %v1187_v60  ;;  %v1190_v4 = vmax.f32 %v1186_v0, 0.0 }
 0x3cd   :  { %1232 = vst [vmem:[#allocation9 + $0x10] sm:$0xff] %v1274_v2  ;;  %v1275_v5 = vpack.c.bf16 %v1218_v3, %v1217_v62 }
 0x3ce   :  { %1203 = vst [vmem:[#allocation9] sm:$0xff] %v1272_v40  ;;  %v1273_v6 = vpack.c.bf16 %v1190_v4, %v1189_v63 }
 0x3cf   :  { %1233 = vst [vmem:[#allocation9 + $0x18] sm:$0xff] %v1275_v5 }
 0x3d0   :  { %1204 = vst [vmem:[#allocation9 + $0x8] sm:$0xff] %v1273_v6 }
 0x3d1   :  { %1437 = shalt.err (!%p1434_p6)
}
 0x3d2   :  { %s1438_s22 = scalar_lea.hbm %s2045_s5, 512 }
 0x3d3   :  { %p1439_p7 = scmp.ne.s32.totalorder %s2045_s5, %s1438_s22  ;;  %p1442_p8 = scmp.lt.u32.totalorder %s1438_s22, %s2045_s5 }
 0x3d5   :  { %p1444_p9 = pnand %p1442_p8, %p1439_p7 }
 0x3d7   :  { %1447 = shalt.err (!%p1444_p9)
}
 0x3d8   :  { %1245 = dma.vmem_to_hbm [thread:$0]  %s1240_s18, 512, %s2045_s5, [#allocation6], %s1455_s28, %s1455_s28, %s1456_s29  }
 0x3d9   :  { %1452 = dma.done.wait [#allocation6], 512  }
 0x3da   :  { %1453 = vsyncadd [#allocation6], 4294966784 }
 0x3db   :  { %1249 = vsyncpa [#allocation5], 1 }
 0x3dc   :  { %1250 = vsyncpa [#allocation8], 1 }
 0x3dd   :  { %1251 = vsyncpa [#allocation6], 1 }

</bundles_post_ra>
